<compile_context>
chip_gen: v6e
topology: v6e:2x2x1
jax: 0.10.0
libtpu: 0.0.40
codegen_flags: <defaults>
</compile_context>

<pallas_src>
import functools

import jax
import jax.numpy as jnp
from jax import lax
from jax.experimental import pallas as pl
from jax.experimental.pallas import tpu as pltpu

SMALL_NUMBER = 1e-8


# ----------------------------- Pallas kernel ------------------------------- #
def messaging_kernel(idx_ref, ns_ref, wt_ref, bt_ref, wpT_ref, bp_ref,
                     freq_ref, sin_sel_ref, cos_sel_ref,
                     out_ref,
                     prop_ref, acc_ref,
                     *, num_edge_types, msg_mean_aggregation):
    N, D = ns_ref.shape
    T = num_edge_types
    Eb = idx_ref.shape[0]          # edges in this grid step
    Nb = out_ref.shape[1]          # nodes in this output block
    nb = pl.program_id(0)          # node-block index ("parallel")
    eb = pl.program_id(1)          # edge-block index ("arbitrary" reduction)

    # ---- once per node block: fused transform + accumulator init ----------
    @pl.when(eb == 0)
    def _():
        # prop = node_states @ W^T + b, lane-dense (N, T*D); stored bf16 for the
        # bf16 gather matmul below.
        prop = jnp.dot(ns_ref[...], wt_ref[...],
                       preferred_element_type=jnp.float32) + bt_ref[...]
        prop_ref[...] = prop.astype(jnp.bfloat16)
        acc_ref[...] = jnp.zeros_like(acc_ref)

    # ---- per edge block -----------------------------------------------------
    idx = idx_ref[...]                     # (Eb, 4) int32: [src, tgt, pos, etype]
    src, tgt = idx[:, 0:1], idx[:, 1:2]
    pos, etyp = idx[:, 2:3], idx[:, 3:4]

    # 1) gather: (Eb, N) bf16 one-hot vs (1, N) broadcast iota; padded edges carry
    #    an out-of-range sentinel -> all-zero row (no validity masks).
    node_iota = lax.broadcasted_iota(jnp.int32, (1, N), 1)
    onehot_src = (src == node_iota).astype(jnp.bfloat16)              # (Eb, N)
    msg_all = jnp.dot(onehot_src, prop_ref[...],
                      preferred_element_type=jnp.float32)             # (Eb, T*D)

    # 2) per-edge type selection: T static masked adds over D-lane blocks
    #    (edges are packed contiguously per type, so within a block this is one
    #    effective add; masked form stays correct for any block/type alignment).
    msg_src = jnp.zeros((Eb, D), jnp.float32)
    for t in range(T):
        sel = (etyp == t).astype(jnp.float32)                         # (Eb, 1)
        msg_src = msg_src + msg_all[:, t * D:(t + 1) * D] * sel

    # 3) positional gating generated in-kernel on the EUP (no 512-row table and
    #    no (Eb, 512) gather):  pe = [sin(p*f), cos(p*f), 0-pad]
    phase = pos.astype(jnp.float32) * freq_ref[...]                   # (Eb, D)
    pe = jnp.sin(phase) * sin_sel_ref[...] + jnp.cos(phase) * cos_sel_ref[...]
    gate = 2.0 * jax.nn.sigmoid(
        jnp.dot(pe, wpT_ref[...], preferred_element_type=jnp.float32)
        + bp_ref[...])                                                # (Eb, D)

    # 4) transposed scatter with bincount fused in: [gated | ones] against the
    #    target one-hot, contracting the edge axis -> (2D, Nb) lane-dense block.
    gated = (msg_src * gate).astype(jnp.bfloat16)                     # (Eb, D)
    if msg_mean_aggregation:
        msg_aug = jnp.concatenate(
            [gated, jnp.ones((Eb, D), jnp.bfloat16)], axis=1)         # (Eb, 2D)
    else:
        msg_aug = gated

    tgt_iota = lax.broadcasted_iota(jnp.int32, (1, Nb), 1) + nb * Nb
    onehot_tgt = (tgt == tgt_iota).astype(jnp.bfloat16)               # (Eb, Nb)
    scat = lax.dot_general(msg_aug, onehot_tgt,
                           (((0,), (0,)), ((), ())),
                           preferred_element_type=jnp.float32)        # (2D|D, Nb)
    acc_ref[...] += scat

    # ---- finalize on the last edge block -----------------------------------
    @pl.when(eb == pl.num_programs(1) - 1)
    def _():
        msgs = acc_ref[0:D, :]
        if msg_mean_aggregation:
            cnt = acc_ref[D:2 * D, :]                 # counts, replicated on sublanes
            divisor = jnp.where(cnt == 0.0, 1.0, cnt) + SMALL_NUMBER
            inv = pl.reciprocal(divisor, approx=True) # EUP, not a VPU divide
            inv = inv * (2.0 - divisor * inv)         # one Newton step
            msgs = msgs * inv
        out_ref[...] = msgs.astype(out_ref.dtype)


# ---------------------- one-time parameter / data prep --------------------- #
def prepare_messaging_params(W, b, Wp, bp, emb_size, dpad):
    """One-time repack of MessagingLayer parameters into kernel-ready layout."""
    TD, D = W.shape
    T = TD // D
    assert T * D == TD
    half = emb_size // 2
    assert 2 * half + dpad == D, "hidden_size must equal emb_size + selector_size"
    # Fused transform: prop = node_states @ W.T + b is directly the (N, T*D)
    # layout where lanes [t*D:(t+1)*D] belong to edge type t.
    Wt_flat = jnp.asarray(W.T)                       # (D, T*D), lane-dense
    bt_flat = b.reshape(1, TD)
    # sinusoid generator rows (PositionEmbeddings: demb=emb_size, dpad pad lanes)
    inv_freq = (1.0 / (10000.0 ** (jnp.arange(0.0, emb_size, 2.0) / emb_size))
                ).astype(jnp.float32)
    freq = jnp.zeros((1, D), jnp.float32)
    freq = freq.at[0, :half].set(inv_freq).at[0, half:2 * half].set(inv_freq)
    sin_sel = jnp.zeros((1, D), jnp.float32).at[0, :half].set(1.0)
    cos_sel = jnp.zeros((1, D), jnp.float32).at[0, half:2 * half].set(1.0)
    return dict(Wt_flat=Wt_flat, bt_flat=bt_flat, WpT=jnp.asarray(Wp.T),
                bp=bp.reshape(1, D), freq=freq, sin_sel=sin_sel, cos_sel=cos_sel,
                T=T)


def pack_edges(edge_lists, pos_lists, num_nodes, max_edges_per_type):
    """Pad ragged per-type edge lists into one flat (T*M, 4) int32 array.

    Columns are [src, tgt, pos, edge_type]. Padded slots get out-of-range node
    sentinels so they vanish in the one-hot compares (no in-kernel masks).
    """
    T, M = len(edge_lists), max_edges_per_type
    idx = jnp.zeros((T * M, 4), jnp.int32)
    idx = idx.at[:, 0].set(num_nodes)      # src sentinel (>= num_nodes)
    idx = idx.at[:, 1].set(num_nodes)      # tgt sentinel
    for t, el in enumerate(edge_lists):
        m = el.shape[0]
        assert m <= M
        # sentinel / valid-index collision guard (see perf-review correctness note)
        assert int(jnp.max(el)) < num_nodes, "edge index >= num_nodes"
        idx = idx.at[t * M:t * M + m, 0].set(el[:, 0])
        idx = idx.at[t * M:t * M + m, 1].set(el[:, 1])
        idx = idx.at[t * M:t * M + m, 2].set(pos_lists[t])
        idx = idx.at[t * M:(t + 1) * M, 3].set(t)
    return idx


def messaging_layer(node_states, edge_idx, params, *,
                    msg_mean_aggregation=True, edge_block=None):
    N, D = node_states.shape
    T = params["T"]
    TM = edge_idx.shape[0]
    Eb = edge_block or TM
    assert TM % Eb == 0 and Eb % 8 == 0
    Nb = N                              # single node block at demo size (see TODO)
    num_node_blocks = N // Nb
    num_edge_blocks = TM // Eb
    acc_rows = 2 * D if msg_mean_aggregation else D

    kernel = functools.partial(messaging_kernel, num_edge_types=T,
                               msg_mean_aggregation=msg_mean_aggregation)

    flops = int(num_node_blocks * (2 * N * D * T * D        # fused transform
                                   + 2 * TM * N * T * D     # one-hot gather
                                   + 2 * TM * D * D)        # positional transform
                + 2 * TM * N * acc_rows)                    # scatter (+ bincount)
    cost = pl.CostEstimate(
        flops=flops,
        transcendentals=int(3 * TM * D * num_node_blocks),  # sin, cos, sigmoid
        bytes_accessed=int(4 * (N * D + D * T * D + D * D + 4 * TM + D * N)))

    const = lambda nb, eb: (0, 0)   # weights / full node_states: same block always
    out_dn = pl.pallas_call(
        kernel,
        out_shape=jax.ShapeDtypeStruct((D, N), jnp.float32),   # lane-dense on nodes
        grid=(num_node_blocks, num_edge_blocks),
        in_specs=[
            pl.BlockSpec((Eb, 4), lambda nb, eb: (eb, 0)),      # packed edge indices
            pl.BlockSpec((N, D), const),                        # node_states (full)
            pl.BlockSpec((D, T * D), const),                    # Wt_flat
            pl.BlockSpec((1, T * D), const),                    # bt_flat
            pl.BlockSpec((D, D), const),                        # WpT
            pl.BlockSpec((1, D), const),                        # bp
            pl.BlockSpec((1, D), const),                        # freq
            pl.BlockSpec((1, D), const),                        # sin_sel
            pl.BlockSpec((1, D), const),                        # cos_sel
        ],
        out_specs=pl.BlockSpec((D, Nb), lambda nb, eb: (0, nb)),  # accumulator block
        scratch_shapes=[pltpu.VMEM((N, T * D), jnp.bfloat16),     # fused transform
                        pltpu.VMEM((acc_rows, Nb), jnp.float32)], # [msg | count] acc
        compiler_params=pltpu.CompilerParams(
            dimension_semantics=("parallel", "arbitrary"),
            vmem_limit_bytes=32 * 1024 * 1024),   # explicit: v5e default is 16 MiB
        cost_estimate=cost,
    )(edge_idx, node_states,
      params["Wt_flat"], params["bt_flat"], params["WpT"], params["bp"],
      params["freq"], params["sin_sel"], params["cos_sel"])

    # Production code would keep the lane-dense (D, N) layout downstream; the demo
    # transposes back to (N, D) for comparison with the reference.
    return out_dn.T


# ------------------------------ reference ---------------------------------- #
def position_embeddings(positions, demb, dpad=0):
    """Transformer-like sinusoidal positional embeddings (PositionEmbeddings)."""
    inv_freq = 1.0 / (10000.0 ** (jnp.arange(0.0, demb, 2.0) / demb))
    sinusoid = jnp.outer(positions, inv_freq)
    pos_emb = jnp.concatenate([jnp.sin(sinusoid), jnp.cos(sinusoid)], axis=1)
    if dpad > 0:
        pad = jnp.zeros((positions.shape[0], dpad), pos_emb.dtype)
        pos_emb = jnp.concatenate([pos_emb, pad], axis=1)
    return pos_emb.astype(jnp.float32)


def xavier_uniform(key, shape):
    fan_out, fan_in = shape
    limit = (6.0 / (fan_in + fan_out)) ** 0.5
    return jax.random.uniform(key, shape, jnp.float32, -limit, limit)


def reference(node_states, W, b, Wp, bp, pos_table, edge_lists, pos_lists,
              msg_mean_aggregation=True):
    """Pure-JAX transcription of MessagingLayer.forward (uses the 512-row table)."""
    N, D = node_states.shape
    prop = node_states @ W.T + b                        # (N, T*D)
    gate = 2.0 * jax.nn.sigmoid(pos_table @ Wp.T + bp)  # (512, D)
    msgs = jnp.zeros((N, D), jnp.float32)
    binc = jnp.zeros((N,), jnp.int32)
    for i, el in enumerate(edge_lists):
        src, tgt = el[:, 0], el[:, 1]
        m = prop[src, i * D:(i + 1) * D]
        m = m * gate[pos_lists[i]]
        msgs = msgs.at[tgt].add(m)
        binc = binc + jnp.bincount(tgt, length=N)
    if msg_mean_aggregation:
        div = jnp.where(binc == 0, 1.0, binc.astype(jnp.float32))
        msgs = msgs / (div[:, None] + SMALL_NUMBER)
    return msgs


# --------------------------------- main ------------------------------------ #
if __name__ == "__main__":
    # GGNN-style config: hidden = emb_size + selector_size
    hidden = 32
    edge_type_count = 2
    backward_edges = True
    T = edge_type_count * 2 if backward_edges else edge_type_count
    emb_size, selector_size = 30, 2
    msg_mean_aggregation = True
    n_positions = 512

    N = 32        # nodes
    Mmax = 32     # padded edges per type  ->  TM = 128, 4 edge blocks of 32
    edge_counts = [20, 14, 20, 14]

    keys = jax.random.split(jax.random.PRNGKey(0), 16)

    node_states = jax.random.normal(keys[0], (N, hidden), jnp.float32)
    W = xavier_uniform(keys[1], (hidden * T, hidden))        # transform weight (out, in)
    b = 0.1 * jax.random.normal(keys[2], (hidden * T,), jnp.float32)
    Wp = xavier_uniform(keys[3], (hidden, hidden))           # pos_transform weight
    bp = 0.1 * jax.random.normal(keys[4], (hidden,), jnp.float32)

    edge_lists, pos_lists = [], []
    for i, m in enumerate(edge_counts):
        edge_lists.append(jax.random.randint(keys[5 + i], (m, 2), 0, N, jnp.int32))
        pos_lists.append(jax.random.randint(keys[10 + i], (m,), 0, n_positions,
                                            jnp.int32))

    # one-time parameter repack + edge packing (hoisted out of the per-call path)
    params = prepare_messaging_params(W, b, Wp, bp, emb_size, selector_size)
    edge_idx = pack_edges(edge_lists, pos_lists, N, Mmax)

    out = messaging_layer(node_states, edge_idx, params,
                          msg_mean_aggregation=msg_mean_aggregation,
                          edge_block=32)
    out = jax.block_until_ready(out)

    pos_table = position_embeddings(
        jnp.arange(n_positions, dtype=jnp.float32), emb_size, dpad=selector_size)
    ref = reference(node_states, W, b, Wp, bp, pos_table, edge_lists, pos_lists,
                    msg_mean_aggregation=msg_mean_aggregation)

    assert out.shape == (N, hidden) and out.dtype == jnp.float32
    # 5e-2 tolerance: the gathered/scattered value operands are bf16 on the MXU
    # (~0.4% relative per edge contribution); counts, one-hots and accumulation
    # stay exact f32, as do the transform / gating matmuls.
    assert jnp.allclose(out, ref, atol=5e-2, rtol=5e-2), \
        f"max abs diff {jnp.max(jnp.abs(out - ref))}"

    print("KERNEL_OK")
</pallas_src>

<mosaic_0001>
module attributes {stable_mosaic.version = 11 : i64} {
  func.func @messaging_kernel(%arg0: i32, %arg1: i32, %arg2: memref<32x4xi32, #tpu.memory_space<vmem>>, %arg3: memref<32x32xf32, #tpu.memory_space<vmem>>, %arg4: memref<32x128xf32, #tpu.memory_space<vmem>>, %arg5: memref<1x128xf32, #tpu.memory_space<vmem>>, %arg6: memref<32x32xf32, #tpu.memory_space<vmem>>, %arg7: memref<1x32xf32, #tpu.memory_space<vmem>>, %arg8: memref<1x32xf32, #tpu.memory_space<vmem>>, %arg9: memref<1x32xf32, #tpu.memory_space<vmem>>, %arg10: memref<1x32xf32, #tpu.memory_space<vmem>>, %arg11: memref<32x32xf32, #tpu.memory_space<vmem>>, %arg12: memref<32x128xbf16, #tpu.memory_space<vmem>>, %arg13: memref<64x32xf32, #tpu.memory_space<vmem>>) attributes {dimension_semantics = [#tpu.dimension_semantics<parallel>, #tpu.dimension_semantics<arbitrary>], iteration_bounds = array<i64: 1, 4>, scalar_prefetch = 0 : i64, scratch_operands = 2 : i64, tpu.core_type = #tpu.core_type<tc>, window_params = [{transform_indices = @transform_0, window_bounds = array<i64: 32, 4>}, {pipeline_mode = #tpu.pipeline_mode<synchronous>, transform_indices = @transform_1, window_bounds = array<i64: 32, 32>}, {pipeline_mode = #tpu.pipeline_mode<synchronous>, transform_indices = @transform_2, window_bounds = array<i64: 32, 128>}, {pipeline_mode = #tpu.pipeline_mode<synchronous>, transform_indices = @transform_3, window_bounds = array<i64: 1, 128>}, {pipeline_mode = #tpu.pipeline_mode<synchronous>, transform_indices = @transform_4, window_bounds = array<i64: 32, 32>}, {pipeline_mode = #tpu.pipeline_mode<synchronous>, transform_indices = @transform_5, window_bounds = array<i64: 1, 32>}, {pipeline_mode = #tpu.pipeline_mode<synchronous>, transform_indices = @transform_6, window_bounds = array<i64: 1, 32>}, {pipeline_mode = #tpu.pipeline_mode<synchronous>, transform_indices = @transform_7, window_bounds = array<i64: 1, 32>}, {pipeline_mode = #tpu.pipeline_mode<synchronous>, transform_indices = @transform_8, window_bounds = array<i64: 1, 32>}, {transform_indices = @transform_9, window_bounds = array<i64: 32, 32>}]} {
    %c0_i32 = arith.constant 0 : i32
    %0 = arith.cmpi eq, %arg1, %c0_i32 : i32
    %1 = arith.extui %0 : i1 to i32
    %c0_i32_0 = arith.constant 0 : i32
    %2 = arith.cmpi ne, %1, %c0_i32_0 : i32
    scf.if %2 {
      %c0_27 = arith.constant 0 : index
      %c0_28 = arith.constant 0 : index
      %97 = vector.load %arg3[%c0_27, %c0_28] : memref<32x32xf32, #tpu.memory_space<vmem>>, vector<32x32xf32>
      %c0_29 = arith.constant 0 : index
      %c0_30 = arith.constant 0 : index
      %98 = vector.load %arg4[%c0_29, %c0_30] : memref<32x128xf32, #tpu.memory_space<vmem>>, vector<32x128xf32>
      %cst_31 = arith.constant dense<0.000000e+00> : vector<32x128xf32>
      %99 = tpu.matmul %97, %98, %cst_31 {dimension_numbers = #tpu.dot_dimension_numbers<[1], [0], [0], [1], [0, 0, 1, 1], [], []>} : vector<32x32xf32>, vector<32x128xf32>, vector<32x128xf32> -> vector<32x128xf32>
      %c0_32 = arith.constant 0 : index
      %c0_33 = arith.constant 0 : index
      %100 = vector.load %arg5[%c0_32, %c0_33] : memref<1x128xf32, #tpu.memory_space<vmem>>, vector<1x128xf32>
      %101 = vector.broadcast %100 : vector<1x128xf32> to vector<32x128xf32>
      %102 = arith.addf %99, %101 : vector<32x128xf32>
      %103 = arith.truncf %102 : vector<32x128xf32> to vector<32x128xbf16>
      %c0_34 = arith.constant 0 : index
      %c0_35 = arith.constant 0 : index
      %104 = vector.load %arg12[%c0_34, %c0_35] : memref<32x128xbf16, #tpu.memory_space<vmem>>, vector<32x128xbf16>
      tpu.vector_store %arg12[%c0_34, %c0_35], %103 {strides = array<i32>} : memref<32x128xbf16, #tpu.memory_space<vmem>>, vector<32x128xbf16>,
      %cst_36 = arith.constant 0.000000e+00 : f32
      %105 = vector.broadcast %cst_36 : f32 to vector<64x32xf32>
      %c0_37 = arith.constant 0 : index
      %c0_38 = arith.constant 0 : index
      %106 = vector.load %arg13[%c0_37, %c0_38] : memref<64x32xf32, #tpu.memory_space<vmem>>, vector<64x32xf32>
      tpu.vector_store %arg13[%c0_37, %c0_38], %105 {strides = array<i32>} : memref<64x32xf32, #tpu.memory_space<vmem>>, vector<64x32xf32>,
    } else {
    }
    %c0 = arith.constant 0 : index
    %c0_1 = arith.constant 0 : index
    %3 = vector.load %arg2[%c0, %c0_1] : memref<32x4xi32, #tpu.memory_space<vmem>>, vector<32x4xi32>
    %4 = vector.extract_strided_slice %3 {offsets = [0, 0], sizes = [32, 1], strides = [1, 1]} : vector<32x4xi32> to vector<32x1xi32>
    %5 = vector.extract_strided_slice %3 {offsets = [0, 1], sizes = [32, 1], strides = [1, 1]} : vector<32x4xi32> to vector<32x1xi32>
    %6 = vector.extract_strided_slice %3 {offsets = [0, 2], sizes = [32, 1], strides = [1, 1]} : vector<32x4xi32> to vector<32x1xi32>
    %7 = vector.extract_strided_slice %3 {offsets = [0, 3], sizes = [32, 1], strides = [1, 1]} : vector<32x4xi32> to vector<32x1xi32>
    %8 = tpu.iota {dimensions = array<i32: 1>} : vector<1x32xi32>
    %9 = vector.broadcast %4 : vector<32x1xi32> to vector<32x32xi32>
    %10 = vector.broadcast %8 : vector<1x32xi32> to vector<32x32xi32>
    %11 = arith.cmpi eq, %9, %10 : vector<32x32xi32>
    %12 = arith.extui %11 : vector<32x32xi1> to vector<32x32xi32>
    %13 = arith.sitofp %12 : vector<32x32xi32> to vector<32x32xf32>
    %14 = arith.truncf %13 : vector<32x32xf32> to vector<32x32xbf16>
    %c0_2 = arith.constant 0 : index
    %c0_3 = arith.constant 0 : index
    %15 = vector.load %arg12[%c0_2, %c0_3] : memref<32x128xbf16, #tpu.memory_space<vmem>>, vector<32x128xbf16>
    %cst = arith.constant dense<0.000000e+00> : vector<32x128xf32>
    %16 = tpu.matmul %14, %15, %cst {dimension_numbers = #tpu.dot_dimension_numbers<[1], [0], [0], [1], [0, 0, 1, 1], [], []>} : vector<32x32xbf16>, vector<32x128xbf16>, vector<32x128xf32> -> vector<32x128xf32>
    %cst_4 = arith.constant 0.000000e+00 : f32
    %17 = vector.broadcast %cst_4 : f32 to vector<32x32xf32>
    %c0_i32_5 = arith.constant 0 : i32
    %18 = vector.broadcast %c0_i32_5 : i32 to vector<32x1xi32>
    %19 = arith.cmpi eq, %7, %18 : vector<32x1xi32>
    %20 = arith.extui %19 : vector<32x1xi1> to vector<32x1xi32>
    %21 = arith.sitofp %20 : vector<32x1xi32> to vector<32x1xf32>
    %22 = vector.extract_strided_slice %16 {offsets = [0, 0], sizes = [32, 32], strides = [1, 1]} : vector<32x128xf32> to vector<32x32xf32>
    %23 = vector.broadcast %21 : vector<32x1xf32> to vector<32x32xf32>
    %24 = arith.mulf %22, %23 : vector<32x32xf32>
    %25 = arith.addf %17, %24 : vector<32x32xf32>
    %c1_i32 = arith.constant 1 : i32
    %26 = vector.broadcast %c1_i32 : i32 to vector<32x1xi32>
    %27 = arith.cmpi eq, %7, %26 : vector<32x1xi32>
    %28 = arith.extui %27 : vector<32x1xi1> to vector<32x1xi32>
    %29 = arith.sitofp %28 : vector<32x1xi32> to vector<32x1xf32>
    %30 = vector.extract_strided_slice %16 {offsets = [0, 32], sizes = [32, 32], strides = [1, 1]} : vector<32x128xf32> to vector<32x32xf32>
    %31 = vector.broadcast %29 : vector<32x1xf32> to vector<32x32xf32>
    %32 = arith.mulf %30, %31 : vector<32x32xf32>
    %33 = arith.addf %25, %32 : vector<32x32xf32>
    %c2_i32 = arith.constant 2 : i32
    %34 = vector.broadcast %c2_i32 : i32 to vector<32x1xi32>
    %35 = arith.cmpi eq, %7, %34 : vector<32x1xi32>
    %36 = arith.extui %35 : vector<32x1xi1> to vector<32x1xi32>
    %37 = arith.sitofp %36 : vector<32x1xi32> to vector<32x1xf32>
    %38 = vector.extract_strided_slice %16 {offsets = [0, 64], sizes = [32, 32], strides = [1, 1]} : vector<32x128xf32> to vector<32x32xf32>
    %39 = vector.broadcast %37 : vector<32x1xf32> to vector<32x32xf32>
    %40 = arith.mulf %38, %39 : vector<32x32xf32>
    %41 = arith.addf %33, %40 : vector<32x32xf32>
    %c3_i32 = arith.constant 3 : i32
    %42 = vector.broadcast %c3_i32 : i32 to vector<32x1xi32>
    %43 = arith.cmpi eq, %7, %42 : vector<32x1xi32>
    %44 = arith.extui %43 : vector<32x1xi1> to vector<32x1xi32>
    %45 = arith.sitofp %44 : vector<32x1xi32> to vector<32x1xf32>
    %46 = vector.extract_strided_slice %16 {offsets = [0, 96], sizes = [32, 32], strides = [1, 1]} : vector<32x128xf32> to vector<32x32xf32>
    %47 = vector.broadcast %45 : vector<32x1xf32> to vector<32x32xf32>
    %48 = arith.mulf %46, %47 : vector<32x32xf32>
    %49 = arith.addf %41, %48 : vector<32x32xf32>
    %50 = arith.sitofp %6 : vector<32x1xi32> to vector<32x1xf32>
    %c0_6 = arith.constant 0 : index
    %c0_7 = arith.constant 0 : index
    %51 = vector.load %arg8[%c0_6, %c0_7] : memref<1x32xf32, #tpu.memory_space<vmem>>, vector<1x32xf32>
    %52 = vector.broadcast %50 : vector<32x1xf32> to vector<32x32xf32>
    %53 = vector.broadcast %51 : vector<1x32xf32> to vector<32x32xf32>
    %54 = arith.mulf %52, %53 : vector<32x32xf32>
    %55 = math.sin %54 : vector<32x32xf32>
    %c0_8 = arith.constant 0 : index
    %c0_9 = arith.constant 0 : index
    %56 = vector.load %arg9[%c0_8, %c0_9] : memref<1x32xf32, #tpu.memory_space<vmem>>, vector<1x32xf32>
    %57 = vector.broadcast %56 : vector<1x32xf32> to vector<32x32xf32>
    %58 = arith.mulf %55, %57 : vector<32x32xf32>
    %59 = math.cos %54 : vector<32x32xf32>
    %c0_10 = arith.constant 0 : index
    %c0_11 = arith.constant 0 : index
    %60 = vector.load %arg10[%c0_10, %c0_11] : memref<1x32xf32, #tpu.memory_space<vmem>>, vector<1x32xf32>
    %61 = vector.broadcast %60 : vector<1x32xf32> to vector<32x32xf32>
    %62 = arith.mulf %59, %61 : vector<32x32xf32>
    %63 = arith.addf %58, %62 : vector<32x32xf32>
    %c0_12 = arith.constant 0 : index
    %c0_13 = arith.constant 0 : index
    %64 = vector.load %arg6[%c0_12, %c0_13] : memref<32x32xf32, #tpu.memory_space<vmem>>, vector<32x32xf32>
    %cst_14 = arith.constant dense<0.000000e+00> : vector<32x32xf32>
    %65 = tpu.matmul %63, %64, %cst_14 {dimension_numbers = #tpu.dot_dimension_numbers<[1], [0], [0], [1], [0, 0, 1, 1], [], []>} : vector<32x32xf32>, vector<32x32xf32>, vector<32x32xf32> -> vector<32x32xf32>
    %c0_15 = arith.constant 0 : index
    %c0_16 = arith.constant 0 : index
    %66 = vector.load %arg7[%c0_15, %c0_16] : memref<1x32xf32, #tpu.memory_space<vmem>>, vector<1x32xf32>
    %67 = vector.broadcast %66 : vector<1x32xf32> to vector<32x32xf32>
    %68 = arith.addf %65, %67 : vector<32x32xf32>
    %69 = arith.negf %68 : vector<32x32xf32>
    %70 = math.exp %69 : vector<32x32xf32>
    %cst_17 = arith.constant 1.000000e+00 : f32
    %71 = vector.broadcast %cst_17 : f32 to vector<32x32xf32>
    %72 = arith.addf %71, %70 : vector<32x32xf32>
    %73 = arith.divf %71, %72 : vector<32x32xf32>
    %cst_18 = arith.constant 2.000000e+00 : f32
    %74 = vector.broadcast %cst_18 : f32 to vector<32x32xf32>
    %75 = arith.mulf %74, %73 : vector<32x32xf32>
    %76 = arith.mulf %49, %75 : vector<32x32xf32>
    %77 = arith.truncf %76 : vector<32x32xf32> to vector<32x32xbf16>
    %cst_19 = arith.constant 1.000000e+00 : bf16
    %78 = vector.broadcast %cst_19 : bf16 to vector<32x32xbf16>
    %79 = tpu.concatenate %77, %78 in 1 : vector<32x32xbf16>, vector<32x32xbf16> -> vector<32x64xbf16>
    %80 = tpu.iota {dimensions = array<i32: 1>} : vector<1x32xi32>
    %c32_i32 = arith.constant 32 : i32
    %81 = arith.muli %arg0, %c32_i32 : i32
    %82 = vector.broadcast %81 : i32 to vector<1x32xi32>
    %83 = arith.addi %80, %82 : vector<1x32xi32>
    %84 = vector.broadcast %5 : vector<32x1xi32> to vector<32x32xi32>
    %85 = vector.broadcast %83 : vector<1x32xi32> to vector<32x32xi32>
    %86 = arith.cmpi eq, %84, %85 : vector<32x32xi32>
    %87 = arith.extui %86 : vector<32x32xi1> to vector<32x32xi32>
    %88 = arith.sitofp %87 : vector<32x32xi32> to vector<32x32xf32>
    %89 = arith.truncf %88 : vector<32x32xf32> to vector<32x32xbf16>
    %cst_20 = arith.constant dense<0.000000e+00> : vector<64x32xf32>
    %90 = tpu.matmul %79, %89, %cst_20 {dimension_numbers = #tpu.dot_dimension_numbers<[0], [0], [1], [1], [0, 1, 1, 1], [], []>} : vector<32x64xbf16>, vector<32x32xbf16>, vector<64x32xf32> -> vector<64x32xf32>
    %c0_21 = arith.constant 0 : index
    %c0_22 = arith.constant 0 : index
    %91 = vector.load %arg13[%c0_21, %c0_22] : memref<64x32xf32, #tpu.memory_space<vmem>>, vector<64x32xf32>
    %92 = arith.addf %91, %90 : vector<64x32xf32>
    %c0_23 = arith.constant 0 : index
    %c0_24 = arith.constant 0 : index
    %93 = vector.load %arg13[%c0_23, %c0_24] : memref<64x32xf32, #tpu.memory_space<vmem>>, vector<64x32xf32>
    tpu.vector_store %arg13[%c0_23, %c0_24], %92 {strides = array<i32>} : memref<64x32xf32, #tpu.memory_space<vmem>>, vector<64x32xf32>,
    %c3_i32_25 = arith.constant 3 : i32
    %94 = arith.cmpi eq, %arg1, %c3_i32_25 : i32
    %95 = arith.extui %94 : i1 to i32
    %c0_i32_26 = arith.constant 0 : i32
    %96 = arith.cmpi ne, %95, %c0_i32_26 : i32
    scf.if %96 {
      %c0_27 = arith.constant 0 : index
      %c0_28 = arith.constant 0 : index
      %97 = vector.load %arg13[%c0_27, %c0_28] : memref<64x32xf32, #tpu.memory_space<vmem>>, vector<32x32xf32>
      %c32 = arith.constant 32 : index
      %c0_29 = arith.constant 0 : index
      %98 = vector.load %arg13[%c32, %c0_29] : memref<64x32xf32, #tpu.memory_space<vmem>>, vector<32x32xf32>
      %cst_30 = arith.constant 0.000000e+00 : f32
      %99 = vector.broadcast %cst_30 : f32 to vector<32x32xf32>
      %100 = arith.cmpf oeq, %98, %99 : vector<32x32xf32>
      %cst_31 = arith.constant 1.000000e+00 : f32
      %101 = vector.broadcast %cst_31 : f32 to vector<32x32xf32>
      %102 = arith.select %100, %101, %98 : vector<32x32xi1>, vector<32x32xf32>
      %cst_32 = arith.constant 9.99999993E-9 : f32
      %103 = vector.broadcast %cst_32 : f32 to vector<32x32xf32>
      %104 = arith.addf %102, %103 : vector<32x32xf32>
      %105 = tpu.reciprocal %104 {approx = true} : vector<32x32xf32> -> vector<32x32xf32>
      %106 = arith.mulf %104, %105 : vector<32x32xf32>
      %cst_33 = arith.constant 2.000000e+00 : f32
      %107 = vector.broadcast %cst_33 : f32 to vector<32x32xf32>
      %108 = arith.subf %107, %106 : vector<32x32xf32>
      %109 = arith.mulf %105, %108 : vector<32x32xf32>
      %110 = arith.mulf %97, %109 : vector<32x32xf32>
      %c0_34 = arith.constant 0 : index
      %c0_35 = arith.constant 0 : index
      %111 = vector.load %arg11[%c0_34, %c0_35] : memref<32x32xf32, #tpu.memory_space<vmem>>, vector<32x32xf32>
      tpu.vector_store %arg11[%c0_34, %c0_35], %110 {strides = array<i32>} : memref<32x32xf32, #tpu.memory_space<vmem>>, vector<32x32xf32>,
    } else {
    }
    return
  }
  func.func @transform_0(%arg0: i32, %arg1: i32) -> (i32, i32) {
    %c0_i32 = arith.constant 0 : i32
    %c0_i32_0 = arith.constant 0 : i32
    return %arg1, %c0_i32 : i32, i32
  }
  func.func @transform_1(%arg0: i32, %arg1: i32) -> (i32, i32) {
    %c0_i32 = arith.constant 0 : i32
    %c0_i32_0 = arith.constant 0 : i32
    %c0_i32_1 = arith.constant 0 : i32
    return %c0_i32, %c0_i32_0 : i32, i32
  }
  func.func @transform_2(%arg0: i32, %arg1: i32) -> (i32, i32) {
    %c0_i32 = arith.constant 0 : i32
    %c0_i32_0 = arith.constant 0 : i32
    %c0_i32_1 = arith.constant 0 : i32
    return %c0_i32, %c0_i32_0 : i32, i32
  }
  func.func @transform_3(%arg0: i32, %arg1: i32) -> (i32, i32) {
    %c0_i32 = arith.constant 0 : i32
    %c0_i32_0 = arith.constant 0 : i32
    %c0_i32_1 = arith.constant 0 : i32
    return %c0_i32, %c0_i32_0 : i32, i32
  }
  func.func @transform_4(%arg0: i32, %arg1: i32) -> (i32, i32) {
    %c0_i32 = arith.constant 0 : i32
    %c0_i32_0 = arith.constant 0 : i32
    %c0_i32_1 = arith.constant 0 : i32
    return %c0_i32, %c0_i32_0 : i32, i32
  }
  func.func @transform_5(%arg0: i32, %arg1: i32) -> (i32, i32) {
    %c0_i32 = arith.constant 0 : i32
    %c0_i32_0 = arith.constant 0 : i32
    %c0_i32_1 = arith.constant 0 : i32
    return %c0_i32, %c0_i32_0 : i32, i32
  }
  func.func @transform_6(%arg0: i32, %arg1: i32) -> (i32, i32) {
    %c0_i32 = arith.constant 0 : i32
    %c0_i32_0 = arith.constant 0 : i32
    %c0_i32_1 = arith.constant 0 : i32
    return %c0_i32, %c0_i32_0 : i32, i32
  }
  func.func @transform_7(%arg0: i32, %arg1: i32) -> (i32, i32) {
    %c0_i32 = arith.constant 0 : i32
    %c0_i32_0 = arith.constant 0 : i32
    %c0_i32_1 = arith.constant 0 : i32
    return %c0_i32, %c0_i32_0 : i32, i32
  }
  func.func @transform_8(%arg0: i32, %arg1: i32) -> (i32, i32) {
    %c0_i32 = arith.constant 0 : i32
    %c0_i32_0 = arith.constant 0 : i32
    %c0_i32_1 = arith.constant 0 : i32
    return %c0_i32, %c0_i32_0 : i32, i32
  }
  func.func @transform_9(%arg0: i32, %arg1: i32) -> (i32, i32) {
    %c0_i32 = arith.constant 0 : i32
    %c0_i32_0 = arith.constant 0 : i32
    return %c0_i32, %arg0 : i32, i32
  }
}

</mosaic_0001>

<bundles_post_ra>
// kernel: tpu_custom_call.1
= control target key start
LH: loop header
LB: loop body
LE: loop exit
PB: predicated region body
PF: predicated region fallthrough
CT: control target
= control target key end

     0   :  { %14 = vsyncpa [#allocation5], 0  ;;  %s2568_s30 = smov 0   ;;  %s2570_s10 = smov 0   ;;  %s3147_s0 = inlined_call_operand.vmem [shape: s32[128,4], index: 0, kind: input, shape index: {}]   ;;  %s3148_s1 = inlined_call_operand.vmem [shape: f32[32,32], index: 1, kind: input, shape index: {}]   ;;  %s3149_s2 = inlined_call_operand.vmem [shape: f32[32,128], index: 2, kind: input, shape index: {}]   ;;  %s3150_s3 = inlined_call_operand.vmem [shape: f32[1,128], index: 3, kind: input, shape index: {}]   ;;  %s3151_s4 = inlined_call_operand.vmem [shape: f32[32,32], index: 4, kind: input, shape index: {}]   ;;  %s3152_s5 = inlined_call_operand.vmem [shape: f32[1,32], index: 5, kind: input, shape index: {}]   ;;  %s3153_s6 = inlined_call_operand.vmem [shape: f32[1,32], index: 6, kind: input, shape index: {}]   ;;  %s3154_s7 = inlined_call_operand.vmem [shape: f32[1,32], index: 7, kind: input, shape index: {}]   ;;  %s3155_s8 = inlined_call_operand.vmem [shape: f32[1,32], index: 8, kind: input, shape index: {}]   ;;  %s3156_s9 = inlined_call_operand.hbm [shape: f32[32,32], index: 9, kind: output, shape index: {}]  }
   0x1   :  { %s2572_s11 = smov 0  }
   0x2 LB: > { %s2090_s12 = sadd.s32 4294967295, %s2497_s11   ;;  %s29_s13 = sadd.s32 1, %s2493_s10  ;;  %s2497_s11 = sphi %s2572_s11, %s20_s11   ;;  %s2493_s10 = sphi %s2570_s10, %s3165_s10   ;;  %s2489_s30 = sphi %s2568_s30, %s3164_s30  }
   0x3   : > { %p30_p0 = scmp.ge.s32.totalorder %s29_s13, 4  ;;  %p2093_p1 = scmp.ge.s32.totalorder %s2497_s11, 1 }
   0x4   : > { %p301_p2 = scmp.lt.s32.totalorder %s2497_s11, 5 }
   0x5   : > { %s3167_s13 = smov (%p30_p0, %s29_s13), 0 }
   0x6   : > { %p302_p3 = pnand %p2093_p1, %p301_p2 }
   0x7   : > { %s2094_s14 = sshll.u32 (!%p302_p3), %s2489_s30, 2  ;;  %p2096_p5 = scmp.ne.s32.totalorder (!%p302_p3), %s2489_s30, 0 }
   0x8   : > { %305 = sbr.rel (%p302_p3) target bundleno = 1139 (0x473), region = 56  ;;  %p333_p4 = scmp.lt.s32.totalorder (!%p302_p3), %s2094_s14, 15 }
   0xd   : > { %s3169_s14 = smov (!%p333_p4, %s2094_s14), 15  ;;  %343 = sbr.rel (%p2096_p5) target bundleno = 228 (0xe4), region = 60 }
   0xe   : > { %s2095_s15 = sshll.u32 %s3169_s14, 3 }
   0xf   : > { %s2593_s18 = scalar_lea.vmem %s3147_s0, %s2095_s15 }
  0x12   : > { %v351_v0 = vld [vmem:[%s3149_s2 + $0x18] sm:$0xff]  ;;  %v350_v1 = vld [vmem:[%s3149_s2 + $0x10] sm:$0xff]  ;;  %vm359_vm0 = vcmask 261120   ;;  %v2499_v2 = vmov 0.0   ;;  %v349_v3 = vld [vmem:[%s3149_s2 + $0x8] sm:$0xff] }
  0x13   : > { %2232 = vmatprep.subr.mxu0 %v351_v0  ;;  %2280 = vmatprep.subr.mxu1 %v351_v0  ;;  %477 = vst.msk [vmem:[#allocation3] sm:$0xff] %vm359_vm0, %v2499_v2  ;;  %478 = vst.msk [vmem:[#allocation3 + $0x8] sm:$0xff] %vm359_vm0, %v2499_v2  ;;  %v348_v4 = vld [vmem:[%s3149_s2] sm:$0xff]  ;;  %v346_v6 = vld [vmem:[%s3148_s1 + $0x10] sm:$0xff] }
  0x14   : > { %479 = vst.msk [vmem:[#allocation3 + $0x10] sm:$0xff] %vm359_vm0, %v2499_v2  ;;  %480 = vst.msk [vmem:[#allocation3 + $0x18] sm:$0xff] %vm359_vm0, %v2499_v2  ;;  %2233 = vmatpush3.msra.mxu0 %v351_v0  ;;  %2284 = vmatpush3.msra.mxu1 %v351_v0  ;;  %v344_v5 = vld [vmem:[%s3148_s1] sm:$0xff]  ;;  %v345_v7 = vld [vmem:[%s3148_s1 + $0x8] sm:$0xff] }
  0x15   : > { %481 = vst.msk [vmem:[#allocation3 + $0x20] sm:$0xff] %vm359_vm0, %v2499_v2  ;;  %482 = vst.msk [vmem:[#allocation3 + $0x28] sm:$0xff] %vm359_vm0, %v2499_v2  ;;  %2234 = vmatprep.subr.mxu0 %v350_v1  ;;  %2281 = vmatprep.subr.mxu1 %v350_v1  ;;  %v347_v8 = vld [vmem:[%s3148_s1 + $0x18] sm:$0xff]  ;;  %v2097_v10 = vld [vmem:[%s3150_s3] ss:$0 sm:$0xff] }
  0x16   : > { %483 = vst.msk [vmem:[#allocation3 + $0x30] sm:$0xff] %vm359_vm0, %v2499_v2  ;;  %484 = vst.msk [vmem:[#allocation3 + $0x38] sm:$0xff] %vm359_vm0, %v2499_v2  ;;  %2235 = vmatpush3.msra.mxu0 %v350_v1  ;;  %2285 = vmatpush3.msra.mxu1 %v350_v1 }
  0x17   : > { %2236 = vmatprep.subr.mxu0 %v349_v3  ;;  %2282 = vmatprep.subr.mxu1 %v349_v3 }
  0x18   : > { %2237 = vmatpush3.msra.mxu0 %v349_v3  ;;  %2286 = vmatpush3.msra.mxu1 %v349_v3 }
  0x19   : > { %2238 = vmatprep.subr.mxu0 %v348_v4  ;;  %2283 = vmatprep.subr.mxu1 %v348_v4 }
  0x1a   : > { %2239 = vmatpush3.msra.mxu0 %v348_v4  ;;  %2287 = vmatpush3.msra.mxu1 %v348_v4 }
  0x1b   : > { %2240 = vmatprep.mubr.msk.f32.mxu0 %vm359_vm0, %v344_v5  ;;  %2243 = vmatprep.mubr.msk.f32.mxu1 %vm359_vm0, %v346_v6 }
  0x1c   : > { %2241 = vmatmul.mubr.msk.f32.vlgmr.msra.gmra.mxu0 %vm359_vm0, %v345_v7  ;;  %2244 = vmatmul.mubr.msk.f32.vlgmr.msra.gmra.mxu1 %vm359_vm0, %v347_v8 }
  0xdc   : > { %v2242_v9 = vpop.f32.mrf.mxu0  ;;  %v2245_v11 = vpop.f32.mrf.mxu1 }
  0xdd   : > { %v444_v14 = vadd.f32 %v2242_v9, %v2097_v10  ;;  %v454_v15 = vadd.f32 %v2245_v11, %v2097_v10 }
  0xde   : > { %v438_v12 = vpop.f32.mrf.mxu0  ;;  %v448_v13 = vpop.f32.mrf.mxu1 }
  0xdf   : > { %v439_v16 = vadd.f32 %v2097_v10, %v438_v12  ;;  %v449_v17 = vadd.f32 %v2097_v10, %v448_v13 }
  0xe1   : > { %v2198_v18 = vpack.c.bf16 %v444_v14, %v439_v16  ;;  %v2203_v19 = vpack.c.bf16 %v454_v15, %v449_v17 }
  0xe3   : > { %2199 = vst [vmem:[#allocation2] sm:$0xff] %v2198_v18   ;;  %2205 = vst [vmem:[#allocation2 + $0x8] sm:$0xff] %v2203_v19  }
  0xe4 PF: > { %v2636_v20 = vld [vmem:[%s2593_s18 + $0x10] sm:$0xff]  ;;  %v2639_v21 = vld [vmem:[%s2593_s18] sm:$0xff]  ;;  %v2642_v22 = vld [vmem:[%s2593_s18 + $0x18] sm:$0xff]  ;;  %v2500_v23 = vmov 2   ;;  %v2501_v29 = vmov 0   ;;  %s2511_s21 = smov 96  }
  0xe5   : > { %2354 = vset.pattern.permute.xlu1 %v2500_v23  ;;  %2353 = vset.pattern.permute.xlu0 %v2500_v23  ;;  %v799_v24 = vcvt.s32.f32 %v2636_v20  ;;  %v797_v25 = vcvt.s32.f32 %v2639_v21  ;;  %v2647_v26 = vld [vmem:[%s2593_s18 + $0x8] sm:$0xff]  ;;  %v800_v27 = vcvt.s32.f32 %v2642_v22  ;;  %v2658_v32 = vld [vmem:[%s3153_s6] ss:$0 sm:$0xff]  ;;  %v2687_v63 = vld [vmem:[%s3151_s4 + $0x18] sm:$0xff]  ;;  %v2502_v1 = vmov 683565275  }
  0xe6   : > { %v798_v28 = vcvt.s32.f32 %v2647_v26  ;;  %v2503_v5 = vmov 2475754826   ;;  %v2504_v7 = vmov 2131351028   ;;  %v2505_v9 = vmov 2102212464  }
  0xe7   : > { %814 = vperm.xlu1 %2354, %v799_v24   ;;  %804 = vperm.xlu0 %2353, %v797_v25   ;;  %v2506_v11 = vmov 920167782   ;;  %v2507_v18 = vmov 1326507024   ;;  %s2512_s22 = smov 64   ;;  %s2513_s23 = smov 32  }
  0xe8   : > { %p2186_p6 = scmp.ne.s32.totalorder %s2489_s30, 3 }
  0xea   : > { %v2401_v30 = vld [vmem:[#allocation2 + $0x8] sm:$0xff]   ;;  %v2402_v31 = vld [vmem:[#allocation2] sm:$0xff]  }
  0xeb   : > { %819 = vperm.xlu1 %2354, %v800_v27   ;;  %809 = vperm.xlu0 %2353, %v798_v28  }
  0xec   : > { %2246 = vmatprep.subr.bf16.mxu1 %v2401_v30 }
  0xed   : > { %2247 = vmatpush3.bf16.msra.mxu1 %v2401_v30 }
  0xee   : > { %2248 = vmatprep.subr.bf16.mxu1 %v2402_v31 }
  0xef   : > { %2356 = vset.pattern.permute.xlu1 %v2501_v29  ;;  %2355 = vset.pattern.permute.xlu0 %v2501_v29 }
  0xf0   : > { %495 = vperm.xlu1 %2356, %v2647_v26   ;;  %492 = vperm.xlu0 %2355, %v2639_v21  }
  0xf1   : > { %2249 = vmatpush3.bf16.msra.mxu1 %v2402_v31 }
  0xf2   : > { %2254 = vmatprep.subr.mxu1 %v2687_v63 }
  0xf4   : > { %498 = vperm.xlu1 %2356, %v2636_v20   ;;  %501 = vperm.xlu0 %2355, %v2642_v22  }
 0x162   : > { %v815_v33 = vpop.permute.xlu1 %814  ;;  %v805_v34 = vpop.permute.xlu0 %804 }
 0x163   : > { %v2661_v35 = vmul.f32 %v2658_v32, %v815_v33  ;;  %v2664_v36 = vmul.f32 %v2658_v32, %v805_v34 }
 0x165   : > { %v1040_v37 = vand.u32 2147483647, %v2661_v35  ;;  %v1043_v38 = vand.u32 2139095040, %v2661_v35  ;;  %v832_v39 = vand.u32 2147483647, %v2664_v36  ;;  %v835_v40 = vand.u32 2139095040, %v2664_v36 }
 0x166   : > { %v820_v41 = vpop.permute.xlu1 %819 }
 0x167   : > { %v1044_v42 = vshrl.u32 %v1043_v38, 23  ;;  %v2671_v43 = vmul.f32 %v2658_v32, %v820_v41  ;;  %v1047_v44 = vand.u32 8388607, %v1040_v37  ;;  %v836_v45 = vshrl.u32 %v835_v40, 23 }
 0x168   : > { %v839_v46 = vand.u32 8388607, %v832_v39 }
 0x169   : > { %v2139_v47 = vadd.s32 4294967169, %v1044_v42  ;;  %v2131_v48 = vadd.s32 4294967169, %v836_v45  ;;  %v1147_v49 = vand.u32 2139095040, %v2671_v43  ;;  %v1048_v51 = vor.u32 8388608, %v1047_v44 }
 0x16a   : > { %v840_v52 = vor.u32 8388608, %v839_v46 }
 0x16b   : > { %v1050_v50 = vadd.s32 1, %v2139_v47  ;;  %v842_v53 = vadd.s32 1, %v2131_v48  ;;  %v1148_v54 = vshrl.u32 %v1147_v49, 23  ;;  %v2678_v60 = vshll.u32 %v1048_v51, 8 }
 0x16c   : > { %v2682_v62 = vshll.u32 %v840_v52, 8 }
 0x16d   : > { %vm1051_vm1 = vcmp.gt.s32.totalorder %v1050_v50, 0  ;;  %vm843_vm2 = vcmp.gt.s32.totalorder %v842_v53, 0  ;;  %v2143_v56 = vadd.s32 4294967169, %v1148_v54 }
 0x16e   : > { %v1052_v55 = vsel %vm1051_vm1, %v1050_v50, 0  ;;  %v844_v59 = vsel %vm843_vm2, %v842_v53, 0 }
 0x16f   : > { %v1053_v57 = vshrl.u32 %v1052_v55, 5  ;;  %v1054_v58 = vand.u32 31, %v1052_v55  ;;  %v2680_v61 = vshrl.u32 %v844_v59, 5  ;;  %v846_v3 = vand.u32 31, %v844_v59 }
 0x170   : > { %v2690_v4 = vadd.s32 1, %v2143_v56 }
 0x171   : > { %v1055_v0 = vsub.s32 32, %v1054_v58  ;;  %v1057_v2 = vshll.u32 %v2502_v1, %v1054_v58  ;;  %v1060_v6 = vshll.u32 %v2503_v5, %v1054_v58  ;;  %v1063_v8 = vshll.u32 %v2504_v7, %v1054_v58 }
 0x172   : > { %v1066_v10 = vshll.u32 %v2505_v9, %v1054_v58  ;;  %v1069_v12 = vshll.u32 %v2506_v11, %v1054_v58  ;;  %vm1072_vm3 = vcmp.lt.s32.totalorder %v1053_v57, 1  ;;  %vm1073_vm4 = vcmp.lt.s32.totalorder %v1053_v57, 2 }
 0x173   : > { %v1058_v13 = vshrl.u32 %v2503_v5, %v1055_v0  ;;  %v1061_v14 = vshrl.u32 %v2504_v7, %v1055_v0  ;;  %v1064_v15 = vshrl.u32 %v2505_v9, %v1055_v0  ;;  %v1056_v16 = vshrl.u32 %v2502_v1, %v1055_v0 }
 0x174   : > { %v1067_v17 = vshrl.u32 %v2506_v11, %v1055_v0  ;;  %v1070_v19 = vshrl.u32 %v2507_v18, %v1055_v0  ;;  %v847_v27 = vsub.s32 32, %v846_v3  ;;  %vm1074_vm5 = vcmp.lt.s32.totalorder %v1053_v57, 3 }
 0x175   : > { %v1059_v23 = vor.u32 %v1058_v13, %v1057_v2  ;;  %v1062_v24 = vor.u32 %v1061_v14, %v1060_v6  ;;  %v1065_v25 = vor.u32 %v1064_v15, %v1063_v8  ;;  %vm1075_vm6 = vcmp.lt.s32.totalorder %v1053_v57, 4 }
 0x176   : > { %v1068_v28 = vor.u32 %v1067_v17, %v1066_v10  ;;  %v1071_v29 = vor.u32 %v1070_v19, %v1069_v12  ;;  %v849_v42 = vshll.u32 %v2502_v1, %v846_v3  ;;  %v850_v46 = vshrl.u32 %v2503_v5, %v847_v27 }
 0x177   : > { %v1076_v30 = vsel %vm1072_vm3, %v1056_v16, %v1059_v23  ;;  %v1077_v31 = vsel %vm1075_vm6, %v1065_v25, 2102212464  ;;  %v1080_v33 = vsel %vm1072_vm3, %v1059_v23, %v1062_v24  ;;  %v1084_v34 = vsel %vm1072_vm3, %v1062_v24, %v1065_v25 }
 0x178   : > { %v1078_v38 = vsel %vm1074_vm5, %v1062_v24, %v1077_v31  ;;  %v1081_v40 = vsel %vm1075_vm6, %v1068_v28, 920167782  ;;  %v1085_v41 = vsel %vm1075_vm6, %v1071_v29, 1326507024  ;;  %v852_v47 = vshll.u32 %v2503_v5, %v846_v3 }
 0x179   : > { %v1082_v44 = vsel %vm1074_vm5, %v1065_v25, %v1081_v40  ;;  %v1086_v45 = vsel %vm1074_vm5, %v1068_v28, %v1085_v41  ;;  %v1079_v48 = vsel %vm1073_vm4, %v1076_v30, %v1078_v38  ;;  %v853_v51 = vshrl.u32 %v2504_v7, %v847_v27  ;;  %v810_v41 = vpop.permute.xlu0 %809 }
 0x17a   : > { %v1083_v49 = vsel %vm1073_vm4, %v1080_v33, %v1082_v44  ;;  %v1087_v50 = vsel %vm1073_vm4, %v1084_v34, %v1086_v45  ;;  %v851_v56 = vor.u32 %v850_v46, %v849_v42  ;;  %v855_v59 = vshll.u32 %v2504_v7, %v846_v3 }
 0x17b   : > { %v2714_v52 = vmul.u32.u64.low %v2678_v60, %v1087_v50  ;;  %v2715_v53 = vmul.u32.u64.high %v2678_v60, %v1087_v50, %v2714_v52  ;;  %v2718_v54 = vmul.u32.u64.low %v2678_v60, %v1083_v49  ;;  %v2719_v55 = vmul.u32.u64.high %v2678_v60, %v1083_v49, %v2718_v54 }
 0x17c   : > { %v854_v58 = vor.u32 %v853_v51, %v852_v47  ;;  %v856_v0 = vshrl.u32 %v2505_v9, %v847_v27  ;;  %v848_v57 = vshrl.u32 %v2502_v1, %v847_v27  ;;  %v858_v2 = vshll.u32 %v2505_v9, %v846_v3 }
 0x17d   : > { %v859_v6 = vshrl.u32 %v2506_v11, %v847_v27  ;;  %v862_v8 = vshrl.u32 %v2507_v18, %v847_v27  ;;  %v1095_v10 = vmul.u32 %v2678_v60, %v1079_v48  ;;  %v861_v13 = vshll.u32 %v2506_v11, %v846_v3 }
 0x17e   : > { %v857_v12 = vor.u32 %v856_v0, %v855_v59  ;;  %vm864_vm7 = vcmp.lt.s32.totalorder %v2680_v61, 1  ;;  %vm1097_vm8 = vc.u32 %v2715_v53, %v2718_v54  ;;  %v1098_v14 = vadd.s32 1, %v2719_v55 }
 0x17f   : > { %v860_v15 = vor.u32 %v859_v6, %v858_v2  ;;  %vm865_vm9 = vcmp.lt.s32.totalorder %v2680_v61, 2  ;;  %v863_v16 = vor.u32 %v862_v8, %v861_v13  ;;  %vm866_vm10 = vcmp.lt.s32.totalorder %v2680_v61, 3 }
 0x180   : > { %vm867_vm11 = vcmp.lt.s32.totalorder %v2680_v61, 4  ;;  %v872_v17 = vsel %vm864_vm7, %v851_v56, %v854_v58  ;;  %v1099_v60 = vsel %vm1097_vm8, %v1098_v14, %v2719_v55  ;;  %v876_v23 = vsel %vm864_vm7, %v854_v58, %v857_v12 }
 0x181   : > { %v869_v19 = vsel %vm867_vm11, %v857_v12, 2102212464  ;;  %v873_v3 = vsel %vm867_vm11, %v860_v15, 920167782  ;;  %v1100_v24 = vadd.s32 %v1099_v60, %v1095_v10  ;;  %v868_v25 = vsel %vm864_vm7, %v848_v57, %v851_v56 }
 0x182   : > { %v874_v27 = vsel %vm866_vm10, %v857_v12, %v873_v3  ;;  %v877_v28 = vsel %vm867_vm11, %v863_v16, 1326507024  ;;  %v870_v29 = vsel %vm866_vm10, %v854_v58, %v869_v19  ;;  %vm1155_vm12 = vcmp.gt.s32.totalorder %v2690_v4, 0 }
 0x183   : > { %v875_v30 = vsel %vm865_vm9, %v872_v17, %v874_v27  ;;  %v878_v31 = vsel %vm866_vm10, %v860_v15, %v877_v28  ;;  %v1101_v33 = vadd.s32 536870912, %v1100_v24  ;;  %v1156_v45 = vsel %vm1155_vm12, %v2690_v4, 0 }
 0x184   : > { %v879_v34 = vsel %vm865_vm9, %v876_v23, %v878_v31  ;;  %v2744_v38 = vmul.u32.u64.low %v2682_v62, %v875_v30  ;;  %v2745_v40 = vmul.u32.u64.high %v2682_v62, %v875_v30, %v2744_v38  ;;  %v871_v47 = vsel %vm865_vm9, %v868_v25, %v870_v29 }
 0x185   : > { %v2749_v42 = vmul.u32.u64.low %v2682_v62, %v879_v34  ;;  %v2750_v44 = vmul.u32.u64.high %v2682_v62, %v879_v34, %v2749_v42  ;;  %v2753_v46 = vshrl.u32 %v1101_v33, 30  ;;  %v1158_v48 = vand.u32 31, %v1156_v45 }
 0x186   : > { %v2758_v49 = vmul.f32 %v2658_v32, %v810_v41  ;;  %v890_v51 = vadd.s32 1, %v2745_v40  ;;  %v1144_v52 = vand.u32 2147483647, %v2671_v43  ;;  %v887_v56 = vmul.u32 %v2682_v62, %v871_v47 }
 0x187   : > { %v1103_v50 = vshll.u32 %v2753_v46, 30  ;;  %v1159_v55 = vsub.s32 32, %v1158_v48  ;;  %vm889_vm13 = vc.u32 %v2750_v44, %v2744_v38  ;;  %v489_v0 = vlaneseq }
 0x188   : > { %v891_v61 = vsel %vm889_vm13, %v890_v51, %v2745_v40  ;;  %v1151_v2 = vand.u32 8388607, %v1144_v52  ;;  %v2774_v6 = vshrl.u32 %v1156_v45, 5  ;;  %v939_v62 = vand.u32 2139095040, %v2758_v49 }
 0x189   : > { %v2766_v4 = vsub.s32 %v1100_v24, %v1103_v50  ;;  %v892_v58 = vadd.s32 %v891_v61, %v887_v56  ;;  %v1162_v32 = vshrl.u32 %v2503_v5, %v1159_v55  ;;  %v1165_v59 = vshrl.u32 %v2504_v7, %v1159_v55 }
 0x18a   : > { %v1161_v10 = vshll.u32 %v2502_v1, %v1158_v48  ;;  %v1164_v12 = vshll.u32 %v2503_v5, %v1158_v48  ;;  %v1168_v13 = vshrl.u32 %v2505_v9, %v1159_v55  ;;  %v1167_v15 = vshll.u32 %v2504_v7, %v1158_v48 }
 0x18b   : > { %v1106_v57 = vsub.s32 0, %v2766_v4  ;;  %v893_v8 = vadd.s32 536870912, %v892_v58  ;;  %v1170_v16 = vshll.u32 %v2505_v9, %v1158_v48  ;;  %v1171_v17 = vshrl.u32 %v2506_v11, %v1159_v55 }
 0x18c   : > { %v1163_v19 = vor.u32 %v1162_v32, %v1161_v10  ;;  %v1166_v3 = vor.u32 %v1165_v59, %v1164_v12  ;;  %v1169_v24 = vor.u32 %v1168_v13, %v1167_v15  ;;  %v1174_v27 = vshrl.u32 %v2507_v18, %v1159_v55 }
 0x18d   : > { %v2140_v14 = vmin.u32 %v1106_v57, %v2766_v4  ;;  %v2784_v60 = vshrl.u32 %v893_v8, 30  ;;  %v1172_v25 = vor.u32 %v1171_v17, %v1170_v16  ;;  %v1152_v29 = vor.u32 8388608, %v1151_v2 }
 0x18e   : > { %v936_v30 = vand.u32 2147483647, %v2758_v49  ;;  %v2789_v31 = vand.u32 127, %v489_v0  ;;  %v1173_v34 = vshll.u32 %v2506_v11, %v1158_v48  ;;  %vm1179_vm14 = vcmp.lt.s32.totalorder %v2774_v6, 4 }
 0x18f   : > { %v1108_v23 = vclz %v2140_v14  ;;  %v895_v28 = vshll.u32 %v2784_v60, 30  ;;  %v940_v40 = vshrl.u32 %v939_v62, 23  ;;  %vm1176_vm15 = vcmp.lt.s32.totalorder %v2774_v6, 1 }
 0x190   : > { %vm1178_vm0 = vcmp.lt.s32.totalorder %v2774_v6, 3  ;;  %v1185_v42 = vsel %vm1179_vm14, %v1172_v25, 920167782  ;;  %v1175_v45 = vor.u32 %v1174_v27, %v1173_v34  ;;  %v1184_v47 = vsel %vm1176_vm15, %v1163_v19, %v1166_v3 }
 0x191   : > { %v2141_v33 = vadd.s32 4294967294, %v1108_v23  ;;  %v2793_v41 = vsub.s32 %v892_v58, %v895_v28  ;;  %v1186_v48 = vsel %vm1178_vm0, %v1169_v24, %v1185_v42  ;;  %v943_v56 = vand.u32 8388607, %v936_v30 }
 0x192   : > { %vm1177_vm2 = vcmp.lt.s32.totalorder %v2774_v6, 2  ;;  %v1181_v61 = vsel %vm1179_vm14, %v1169_v24, 2102212464  ;;  %v1192_v58 = vshll.u32 %v1152_v29, 8  ;;  %v2135_v32 = vadd.s32 4294967169, %v940_v40 }
 0x193   : > { %vm2142_vm1 = vcmp.lt.s32.totalorder %v2141_v33, 0  ;;  %v898_v51 = vsub.s32 0, %v2793_v41  ;;  %v1187_v57 = vsel %vm1177_vm2, %v1184_v47, %v1186_v48  ;;  %v1188_v2 = vsel %vm1176_vm15, %v1166_v3, %v1169_v24 }
 0x194   : > { %v1111_v50 = vsel %vm2142_vm1, 0, %v2141_v33  ;;  %v1096_v62 = vadd.s32 %v2718_v54, %v2715_v53  ;;  %v1160_v10 = vshrl.u32 %v2502_v1, %v1159_v55  ;;  %v1189_v12 = vsel %vm1179_vm14, %v1175_v45, 1326507024 }
 0x195   : > { %v1116_v59 = vsub.s32 4294967266, %v1111_v50  ;;  %v2132_v0 = vmin.u32 %v898_v51, %v2793_v41  ;;  %v1112_v8 = vsub.s32 32, %v1111_v50  ;;  %v1190_v14 = vsel %vm1178_vm0, %v1172_v25, %v1189_v12 }
 0x196   : > { %v2821_v15 = vmul.u32.u64.low %v1192_v58, %v1187_v57  ;;  %v2822_v16 = vmul.u32.u64.high %v1192_v58, %v1187_v57, %v2821_v15  ;;  %v1180_v17 = vsel %vm1176_vm15, %v1160_v10, %v1163_v19  ;;  %v1182_v53 = vsel %vm1178_vm0, %v1166_v3, %v1181_v61  ;;  %v496_v61 = vpop.permute.xlu1 %495 }
 0x197   : > { %v900_v13 = vclz %v2132_v0  ;;  %v1191_v54 = vsel %vm1177_vm2, %v1188_v2, %v1190_v14  ;;  %v946_v55 = vadd.s32 1, %v2135_v32  ;;  %v1117_v23 = vadd.s32 127, %v1116_v59  ;;  %v493_v32 = vpop.permute.xlu0 %492 }
 0x198   : > { %v2831_v27 = vmul.u32.u64.low %v1192_v58, %v1191_v54  ;;  %v2832_v28 = vmul.u32.u64.high %v1192_v58, %v1191_v54, %v2831_v27  ;;  %v1114_v25 = vshrl.u32 %v1096_v62, %v1112_v8  ;;  %vm834_vm3 = vcmp.lt.s32.totalorder %v2664_v36, 0 }
 0x199   : > { %v2133_v24 = vadd.s32 4294967294, %v900_v13  ;;  %v944_v29 = vor.u32 8388608, %v943_v56  ;;  %vm947_vm4 = vcmp.gt.s32.totalorder %v946_v55, 0  ;;  %v1183_v19 = vsel %vm1177_vm2, %v1180_v17, %v1182_v53 }
 0x19a   : > { %v1202_v3 = vadd.s32 1, %v2822_v16  ;;  %v948_v33 = vsel %vm947_vm4, %v946_v55, 0  ;;  %v1113_v34 = vshll.u32 %v2766_v4, %v1111_v50  ;;  %v918_v42 = vsub.s32 4, %v2784_v60 }
 0x19b   : > { %vm2134_vm5 = vcmp.lt.s32.totalorder %v2133_v24, 0  ;;  %v950_v45 = vand.u32 31, %v948_v33  ;;  %v1118_v47 = vshll.u32 %v1117_v23, 23  ;;  %v888_v48 = vadd.s32 %v2744_v38, %v2750_v44 }
 0x19c   : > { %v903_v40 = vsel %vm2134_vm5, 0, %v2133_v24  ;;  %v2842_v59 = vor.u32 %v1114_v25, %v1113_v34  ;;  %v1199_v6 = vmul.u32 %v1192_v58, %v1183_v19  ;;  %vm1201_vm6 = vc.u32 %v2832_v28, %v2821_v15 }
 0x19d   : > { %v904_v51 = vsub.s32 32, %v903_v40  ;;  %v908_v56 = vsub.s32 4294967266, %v903_v40  ;;  %v951_v0 = vsub.s32 32, %v950_v45  ;;  %v905_v4 = vshll.u32 %v2793_v41, %v903_v40 }
 0x19e   : > { %v1203_v2 = vsel %vm1201_vm6, %v1202_v3, %v2822_v16  ;;  %v2851_v38 = vsel %vm834_vm3, %v918_v42, %v2784_v60  ;;  %vm504_vm7 = vcmp.eq.s32.totalorder %v496_v61, %v2789_v31  ;;  %vm503_vm8 = vcmp.eq.s32.totalorder %v493_v32, %v2789_v31 }
 0x19f   : > { %v906_v50 = vshrl.u32 %v888_v48, %v904_v51  ;;  %v909_v57 = vadd.s32 127, %v908_v56  ;;  %v1204_v44 = vadd.s32 %v1203_v2, %v1199_v6  ;;  %v1119_v58 = vor.u32 4788187, %v1118_v47 }
 0x1a0   : > { %v2855_v10 = vshll.u32 %v944_v29, 8  ;;  %v1122_v41 = vcvt.s32.f32 %v2842_v59  ;;  %v954_v13 = vshrl.u32 %v2503_v5, %v951_v0  ;;  %v960_v14 = vshrl.u32 %v2505_v9, %v951_v0 }
 0x1a1   : > { %v907_v62 = vor.u32 %v906_v50, %v905_v4  ;;  %v910_v8 = vshll.u32 %v909_v57, 23  ;;  %v1205_v12 = vadd.s32 536870912, %v1204_v44  ;;  %v949_v60 = vshrl.u32 %v948_v33, 5 }
 0x1a2   : > { %v957_v17 = vshrl.u32 %v2504_v7, %v951_v0  ;;  %v959_v53 = vshll.u32 %v2504_v7, %v950_v45  ;;  %v953_v23 = vshll.u32 %v2502_v1, %v950_v45  ;;  %v956_v24 = vshll.u32 %v2503_v5, %v950_v45 }
 0x1a3   : > { %v911_v16 = vor.u32 4788187, %v910_v8  ;;  %v914_v54 = vcvt.s32.f32 %v907_v62  ;;  %v2862_v55 = vshrl.u32 %v1205_v12, 30  ;;  %vm2868_vm9 = vcmp.le.f32.partialorder %v832_v39, 0.7853982 }
 0x1a4   : > { %v961_v29 = vor.u32 %v960_v14, %v959_v53  ;;  %v962_v19 = vshll.u32 %v2505_v9, %v950_v45  ;;  %v963_v3 = vshrl.u32 %v2506_v11, %v951_v0  ;;  %v955_v33 = vor.u32 %v954_v13, %v953_v23 }
 0x1a5   : > { %v912_v25 = vand.u32 2147483647, %v911_v16  ;;  %v1207_v7 = vshll.u32 %v2862_v55, 30  ;;  %v966_v34 = vshrl.u32 %v2507_v18, %v951_v0  ;;  %v2508_v40 = vmov 0.0  }
 0x1a6   : > { %v2107_v5 = vsel %vm504_vm7, 1.0, %v2508_v40  ;;  %v958_v42 = vor.u32 %v957_v17, %v956_v24  ;;  %v964_v47 = vor.u32 %v963_v3, %v962_v19  ;;  %v965_v48 = vshll.u32 %v2506_v11, %v950_v45 }
 0x1a7   : > { %v915_v39 = vmul.f32 %v914_v54, %v912_v25  ;;  %v1120_v51 = vand.u32 2147483647, %v1119_v58  ;;  %v2880_v56 = vsub.s32 %v1204_v44, %v1207_v7  ;;  %v952_v9 = vshrl.u32 %v2502_v1, %v951_v0  ;;  %v499_v58 = vpop.permute.xlu1 %498 }
 0x1a8   : > { %vm971_vm10 = vcmp.lt.s32.totalorder %v949_v60, 4  ;;  %vm533_vm11 = vcmask 261120   ;;  %v967_v6 = vor.u32 %v966_v34, %v965_v48  ;;  %vm968_vm12 = vcmp.lt.s32.totalorder %v949_v60, 1  ;;  %v1688_v48 = vld [vmem:[%s3151_s4 + $0x10] sm:$0xff] }
 0x1a9   : > { %v916_v59 = vxor.u32 2147483648, %v915_v39  ;;  %v973_v18 = vsel %vm971_vm10, %v961_v29, 2102212464  ;;  %v1210_v61 = vsub.s32 0, %v2880_v56  ;;  %vm970_vm13 = vcmp.lt.s32.totalorder %v949_v60, 3 }
 0x1aa   : > { %v972_v4 = vsel %vm968_vm12, %v952_v9, %v955_v33  ;;  %v2106_v11 = vsel %vm503_vm8, 1.0, %v2508_v40  ;;  %v974_v1 = vsel %vm970_vm13, %v958_v42, %v973_v18  ;;  %v976_v0 = vsel %vm968_vm12, %v955_v33, %v958_v42 }
 0x1ab   : > { %v917_v45 = vsel %vm834_vm3, %v916_v59, %v915_v39  ;;  %v977_v50 = vsel %vm971_vm10, %v964_v47, 920167782  ;;  %v1200_v57 = vadd.s32 %v2821_v15, %v2832_v28  ;;  %v2144_v2 = vmin.u32 %v1210_v61, %v2880_v56  ;;  %v502_v28 = vpop.permute.xlu0 %501 }
 0x1ac   : > { %vm969_vm14 = vcmp.lt.s32.totalorder %v949_v60, 2  ;;  %v978_v44 = vsel %vm970_vm13, %v961_v29, %v977_v50  ;;  %v2898_v32 = vmul.f32 %v1122_v41, %v1120_v51  ;;  %v980_v8 = vsel %vm968_vm12, %v958_v42, %v961_v29 }
 0x1ad   : > { %v979_v62 = vsel %vm969_vm14, %v976_v0, %v978_v44  ;;  %v981_v12 = vsel %vm971_vm10, %v967_v6, 1326507024  ;;  %v920_v13 = vsel %vm2868_vm9, %v2664_v36, %v917_v45  ;;  %v1212_v14 = vclz %v2144_v2  ;;  %v1687_v6 = vld [vmem:[%s3151_s4 + $0x8] sm:$0xff] }
 0x1ae   : > { %v975_v16 = vsel %vm969_vm14, %v972_v4, %v974_v1  ;;  %v982_v15 = vsel %vm970_vm13, %v964_v47, %v981_v12  ;;  %v2907_v53 = vmul.u32.u64.low %v2855_v10, %v979_v62  ;;  %v2908_v54 = vmul.u32.u64.high %v2855_v10, %v979_v62, %v2907_v53 }
 0x1af   : > { %v983_v17 = vsel %vm969_vm14, %v980_v8, %v982_v15  ;;  %vm505_vm15 = vcmp.eq.s32.totalorder %v499_v58, %v2789_v31  ;;  %v2145_v41 = vadd.s32 4294967294, %v1212_v14  ;;  %vm506_vm0 = vcmp.eq.s32.totalorder %v502_v28, %v2789_v31 }
 0x1b0   : > { %v2913_v23 = vmul.u32.u64.low %v2855_v10, %v983_v17  ;;  %v2914_v24 = vmul.u32.u64.high %v2855_v10, %v983_v17, %v2913_v23  ;;  %v2108_v25 = vsel %vm505_vm15, 1.0, %v2508_v40  ;;  %v515_v60 = vpack.c.bf16 %v2107_v5, %v2106_v11 }
 0x1b1   : > { %vm629_vm1 = vcmp.eq.s32.totalorder %v2639_v21, 1  ;;  %vm2146_vm2 = vcmp.lt.s32.totalorder %v2145_v41, 0  ;;  %v2109_v29 = vsel %vm506_vm0, 1.0, %v2508_v40  ;;  %v2509_v19 = vmov 3  }
 0x1b2   : > { %2357 = vset.pattern.permute.xlu1 %v2509_v19  ;;  %vm630_vm3 = vcmp.eq.s32.totalorder %v2647_v26, 1  ;;  %v2118_v3 = vsel %vm629_vm1, 1.0, %v2508_v40  ;;  %2363 = vset.pattern.permute.xlu0 %v2509_v19  ;;  %v1215_v7 = vsel %vm2146_vm2, 0, %v2145_v41  ;;  %v994_v33 = vadd.s32 1, %v2908_v54 }
 0x1b3   : > { %v516_v34 = vpack.c.bf16 %v2109_v29, %v2108_v25  ;;  %2250 = vmatprep.mubr.msk.bf16.mxu1 %vm533_vm11, %v515_v60  ;;  %v2119_v5 = vsel %vm630_vm3, 1.0, %v2508_v40  ;;  %2403 = vcosq.f32 %v920_v13  ;;  %v1216_v39 = vsub.s32 32, %v1215_v7 }
 0x1b4   : > { %v1220_v42 = vsub.s32 4294967266, %v1215_v7  ;;  %v991_v47 = vmul.u32 %v2855_v10, %v975_v16  ;;  %vm993_vm4 = vc.u32 %v2914_v24, %v2907_v53  ;;  %v2358_v51 = vpack.i.bf16 %v2119_v5, %v2118_v3 }
 0x1b5   : > { %2251 = vmatmul.mubr.msk.bf16.vlgmr.msra.gmra.mxu1 %vm533_vm11, %v516_v34  ;;  %vm685_vm5 = vcmp.eq.s32.totalorder %v2639_v21, 2  ;;  %vm686_vm6 = vcmp.eq.s32.totalorder %v2647_v26, 2  ;;  %2405 = vsinq.f32 %v920_v13  ;;  %v995_v59 = vsel %vm993_vm4, %v994_v33, %v2908_v54 }
 0x1b6   : > { %v1221_v9 = vadd.s32 127, %v1220_v42  ;;  %v2122_v10 = vsel %vm685_vm5, 1.0, %v2508_v40  ;;  %2255 = vmatpush3.msra.mxu1 %v2687_v63  ;;  %v996_v18 = vadd.s32 %v995_v59, %v991_v47  ;;  %2359 = vperm.xlu1 %2357, %v2358_v51   ;;  %v2123_v61 = vsel %vm686_vm6, 1.0, %v2508_v40  ;;  %v1686_v63 = vld [vmem:[%s3151_s4] sm:$0xff] }
 0x1b7   : > { %vm687_vm7 = vcmp.eq.s32.totalorder %v2636_v20, 2  ;;  %vm688_vm8 = vcmp.eq.s32.totalorder %v2642_v22, 2  ;;  %2256 = vmatprep.subr.mxu1 %v1688_v48  ;;  %v1218_v4 = vshrl.u32 %v1200_v57, %v1216_v39  ;;  %v2369_v45 = vpack.i.bf16 %v2123_v61, %v2122_v10 }
 0x1b8   : > { %v1222_v11 = vshll.u32 %v1221_v9, 23  ;;  %v2124_v1 = vsel %vm687_vm7, 1.0, %v2508_v40  ;;  %2257 = vmatpush3.msra.mxu1 %v1688_v48  ;;  %v997_v0 = vadd.s32 536870912, %v996_v18  ;;  %v2125_v50 = vsel %vm688_vm8, 1.0, %v2508_v40 }
 0x1b9   : > { %vm631_vm10 = vcmp.eq.s32.totalorder %v2636_v20, 1  ;;  %vm632_vm12 = vcmp.eq.s32.totalorder %v2642_v22, 1  ;;  %2258 = vmatprep.subr.mxu1 %v1687_v6  ;;  %v1217_v2 = vshll.u32 %v2880_v56, %v1215_v7  ;;  %v2374_v44 = vpack.i.bf16 %v2125_v50, %v2124_v1 }
 0x1ba   : > { %v1223_v57 = vor.u32 4788187, %v1222_v11  ;;  %v2120_v58 = vsel %vm631_vm10, 1.0, %v2508_v40  ;;  %2259 = vmatpush3.msra.mxu1 %v1687_v6  ;;  %v2952_v62 = vshrl.u32 %v997_v0, 30  ;;  %2370 = vperm.xlu1 %2357, %v2369_v45   ;;  %v2121_v8 = vsel %vm632_vm12, 1.0, %v2508_v40 }
 0x1bb   : > { %vm743_vm13 = vcmp.eq.s32.totalorder %v2636_v20, 3  ;;  %vm744_vm14 = vcmp.eq.s32.totalorder %v2642_v22, 3  ;;  %2260 = vmatprep.subr.mxu1 %v1686_v63  ;;  %v921_v12 = vsel %vm2868_vm9, 0, %v2851_v38  ;;  %v2364_v56 = vpack.i.bf16 %v2121_v8, %v2120_v58 }
 0x1bc   : > { %v2128_v13 = vsel %vm743_vm13, 1.0, %v2508_v40  ;;  %v2129_v14 = vsel %vm744_vm14, 1.0, %v2508_v40  ;;  %2261 = vmatpush3.msra.mxu1 %v1686_v63  ;;  %v1124_v16 = vxor.u32 2147483648, %v2898_v32  ;;  %v1219_v15 = vor.u32 %v1218_v4, %v1217_v2  ;;  %v3005_v63 = vld [vmem:[%s3155_s8] ss:$0 sm:$0xff] }
 0x1bd   : > { %v999_v28 = vshll.u32 %v2952_v62, 30  ;;  %vm741_vm15 = vcmp.eq.s32.totalorder %v2639_v21, 3  ;;  %v1224_v17 = vand.u32 2147483647, %v1223_v57  ;;  %2365 = vperm.xlu0 %2363, %v2364_v56   ;;  %vm742_vm0 = vcmp.eq.s32.totalorder %v2647_v26, 3 }
 0x1be   : > { %v2126_v27 = vsel %vm741_vm15, 1.0, %v2508_v40  ;;  %vm591_vm9 = vcmp.eq.s32.totalorder %v2636_v20, 0  ;;  %2375 = vperm.xlu1 %2357, %v2374_v44   ;;  %v2384_v54 = vpack.i.bf16 %v2129_v14, %v2128_v13  ;;  %v2127_v41 = vsel %vm742_vm0, 1.0, %v2508_v40 }
 0x1bf   : > { %v2968_v38 = vsub.s32 %v996_v18, %v999_v28  ;;  %vm592_vm1 = vcmp.eq.s32.totalorder %v2642_v22, 0  ;;  %v925_v23 = vadd.s32 3, %v921_v12  ;;  %v2379_v25 = vpack.i.bf16 %v2127_v41, %v2126_v27 }
 0x1c0   : > { %v2116_v60 = vsel %vm591_vm9, 1.0, %v2508_v40  ;;  %v2404_v29 = vpop.eup %2403  ;;  %vm1042_vm2 = vcmp.lt.s32.totalorder %v2661_v35, 0  ;;  %v1226_v19 = vcvt.s32.f32 %v1219_v15  ;;  %v2117_v20 = vsel %vm592_vm1, 1.0, %v2508_v40 }
 0x1c1   : > { %v1002_v3 = vsub.s32 0, %v2968_v38  ;;  %v1125_v7 = vsel %vm1042_vm2, %v1124_v16, %v2898_v32  ;;  %2380 = vperm.xlu0 %2363, %v2379_v25   ;;  %vm589_vm3 = vcmp.eq.s32.totalorder %v2639_v21, 0  ;;  %v2394_v5 = vpack.i.bf16 %v2117_v20, %v2116_v60 }
 0x1c2   : > { %v2406_v22 = vpop.eup %2405  ;;  %v1227_v33 = vmul.f32 %v1226_v19, %v1224_v17  ;;  %2385 = vperm.xlu1 %2357, %v2384_v54   ;;  %vm590_vm4 = vcmp.eq.s32.totalorder %v2647_v26, 0  ;;  %v926_v39 = vand.u32 3, %v925_v23  ;;  %v1352_v42 = vand.u32 3, %v921_v12 }
 0x1c3   : > { %v2136_v34 = vmin.u32 %v1002_v3, %v2968_v38  ;;  %v2114_v47 = vsel %vm589_vm3, 1.0, %v2508_v40  ;;  %vm2985_vm5 = vcmp.le.f32.partialorder %v1040_v37, 0.7853982  ;;  %vm924_vm6 = vweird.f32 %v2664_v36 }
 0x1c4   : > { %v1128_v21 = vsel %vm2985_vm5, %v2661_v35, %v1125_v7  ;;  %vm1146_vm7 = vcmp.lt.s32.totalorder %v2671_v43, 0  ;;  %v992_v26 = vadd.s32 %v2907_v53, %v2914_v24  ;;  %v2115_v51 = vsel %vm590_vm4, 1.0, %v2508_v40  ;;  %v3000_v40 = vld [vmem:[%s3154_s7] ss:$0 sm:$0xff] }
 0x1c5   : > { %v1004_v32 = vclz %v2136_v34  ;;  %v1228_v9 = vxor.u32 2147483648, %v1227_v33  ;;  %v2389_v37 = vpack.i.bf16 %v2115_v51, %v2114_v47  ;;  %v929_v10 = vxor.u32 2147483648, %v2406_v22 }
 0x1c6   : > { %2395 = vperm.xlu1 %2357, %v2394_v5   ;;  %vm928_vm8 = vcmp.eq.s32.totalorder %v926_v39, 0  ;;  %vm931_vm10 = vcmp.eq.s32.totalorder %v926_v39, 2  ;;  %v932_v6 = vxor.u32 2147483648, %v2404_v29  ;;  %vm1354_vm12 = vcmp.eq.s32.totalorder %v1352_v42, 0 }
 0x1c7   : > { %v2137_v59 = vadd.s32 4294967294, %v1004_v32  ;;  %2390 = vperm.xlu0 %2363, %v2389_v37   ;;  %v930_v18 = vsel %vm928_vm8, %v2404_v29, %v929_v10  ;;  %v1356_v61 = vsel %vm1354_vm12, %v2404_v29, %v929_v10  ;;  %vm1357_vm14 = vcmp.eq.s32.totalorder %v1352_v42, 2 }
 0x1c8   : > { %vm927_vm15 = vcmp.lt.s32.totalorder %v926_v39, 2  ;;  %v933_v11 = vsel %vm931_vm10, %v932_v6, %v2406_v22  ;;  %v1359_v53 = vsel %vm1357_vm14, %v932_v6, %v2406_v22  ;;  %vm1353_vm0 = vcmp.lt.s32.totalorder %v1352_v42, 2 }
 0x1c9   : > { %vm2138_vm13 = vcmp.lt.s32.totalorder %v2137_v59, 0  ;;  %v934_v1 = vsel %vm927_vm15, %v930_v18, %v933_v11  ;;  %v1229_v0 = vsel %vm1146_vm7, %v1228_v9, %v1227_v33  ;;  %v1360_v57 = vsel %vm1353_vm0, %v1356_v61, %v1359_v53 }
 0x1ca   : > { %v1007_v4 = vsel %vm2138_vm13, 0, %v2137_v59  ;;  %v935_v2 = vsel %vm924_vm6, nan, %v934_v1  ;;  %v1361_v12 = vsel %vm924_vm6, nan, %v1360_v57  ;;  %2407 = vcosq.f32 %v1128_v21 }
 0x1cb   : > { %v1008_v24 = vsub.s32 32, %v1007_v4  ;;  %v1012_v45 = vsub.s32 4294967266, %v1007_v4  ;;  %v1009_v50 = vshll.u32 %v2968_v38, %v1007_v4  ;;  %v1255_v8 = vmul.f32 %v3000_v40, %v935_v2 }
 0x1cc   : > { %v1678_v56 = vmul.f32 %v3005_v63, %v1361_v12  ;;  %2409 = vsinq.f32 %v1128_v21  ;;  %vm3018_vm9 = vcmp.le.f32.partialorder %v1144_v52, 0.7853982  ;;  %v1126_v15 = vsub.s32 4, %v2753_v46 }
 0x1cd   : > { %v1010_v44 = vshrl.u32 %v992_v26, %v1008_v24  ;;  %v1013_v58 = vadd.s32 127, %v1012_v45  ;;  %v1232_v28 = vsel %vm3018_vm9, %v2671_v43, %v1229_v0  ;;  %v1230_v27 = vsub.s32 4, %v2862_v55 }
 0x1ce   : > { %v1682_v36 = vadd.f32 %v1678_v56, %v1255_v8  ;;  %2411 = vcosq.f32 %v1232_v28  ;;  %v1127_v54 = vsel %vm1042_vm2, %v1126_v15, %v2753_v46  ;;  %v1022_v29 = vsub.s32 4, %v2952_v62 }
 0x1cf   : > { %v1011_v14 = vor.u32 %v1010_v44, %v1009_v50  ;;  %v1014_v16 = vshll.u32 %v1013_v58, 23  ;;  %2413 = vsinq.f32 %v1232_v28  ;;  %v1129_v23 = vsel %vm2985_vm5, 0, %v1127_v54 }
 0x1d0   : > { %2262 = vmatprep.mubr.msk.f32.mxu1 %vm533_vm11, %v1682_v36  ;;  %v1231_v25 = vsel %vm1146_vm7, %v1230_v27, %v2862_v55  ;;  %vm938_vm1 = vcmp.lt.s32.totalorder %v2758_v49, 0  ;;  %vm937_vm3 = vcmp.le.f32.partialorder %v936_v30, 0.7853982  ;;  %v1133_v3 = vadd.s32 3, %v1129_v23 }
 0x1d1   : > { %v1015_v17 = vor.u32 4788187, %v1014_v16  ;;  %v1018_v52 = vcvt.s32.f32 %v1011_v14  ;;  %v1233_v46 = vsel %vm3018_vm9, 0, %v1231_v25  ;;  %v1023_v22 = vsel %vm938_vm1, %v1022_v29, %v2952_v62 }
 0x1d2   : > { %v1237_v33 = vadd.s32 3, %v1233_v46  ;;  %v1134_v34 = vand.u32 3, %v1133_v3  ;;  %v1558_v5 = vand.u32 3, %v1129_v23  ;;  %v1025_v39 = vsel %vm937_vm3, 0, %v1023_v22 }
 0x1d3   : > { %v1016_v38 = vand.u32 2147483647, %v1015_v17  ;;  %v1661_v21 = vand.u32 3, %v1233_v46  ;;  %v1029_v26 = vadd.s32 3, %v1025_v39  ;;  %v1455_v51 = vand.u32 3, %v1025_v39 }
 0x1d4   : > { %v1238_v32 = vand.u32 3, %v1237_v33  ;;  %vm1136_vm2 = vcmp.eq.s32.totalorder %v1134_v34, 0  ;;  %vm1139_vm4 = vcmp.eq.s32.totalorder %v1134_v34, 2  ;;  %vm1560_vm5 = vcmp.eq.s32.totalorder %v1558_v5, 0 }
 0x1d5   : > { %v1019_v41 = vmul.f32 %v1018_v52, %v1016_v38  ;;  %vm1563_vm6 = vcmp.eq.s32.totalorder %v1558_v5, 2  ;;  %vm1132_vm7 = vweird.f32 %v2661_v35  ;;  %vm1028_vm8 = vweird.f32 %v2758_v49 }
 0x1d6   : > { %v1030_v18 = vand.u32 3, %v1029_v26  ;;  %vm1456_vm10 = vcmp.lt.s32.totalorder %v1455_v51, 2  ;;  %vm1135_vm12 = vcmp.lt.s32.totalorder %v1134_v34, 2  ;;  %vm1559_vm13 = vcmp.lt.s32.totalorder %v1558_v5, 2 }
 0x1d7   : > { %v1020_v60 = vxor.u32 2147483648, %v1019_v41  ;;  %v2408_v7 = vpop.eup %2407  ;;  %vm1457_vm14 = vcmp.eq.s32.totalorder %v1455_v51, 0  ;;  %vm1460_vm15 = vcmp.eq.s32.totalorder %v1455_v51, 2  ;;  %vm1240_vm0 = vcmp.eq.s32.totalorder %v1238_v32, 0 }
 0x1d8   : > { %v1140_v47 = vxor.u32 2147483648, %v2408_v7  ;;  %vm1243_vm9 = vcmp.eq.s32.totalorder %v1238_v32, 2 }
 0x1d9   : > { %v1021_v19 = vsel %vm938_vm1, %v1020_v60, %v1019_v41  ;;  %v2410_v55 = vpop.eup %2409  ;;  %vm1663_vm1 = vcmp.eq.s32.totalorder %v1661_v21, 0 }
 0x1da   : > { %v1024_v20 = vsel %vm937_vm3, %v2758_v49, %v1021_v19  ;;  %v1137_v42 = vxor.u32 2147483648, %v2410_v55  ;;  %v1141_v9 = vsel %vm1139_vm4, %v1140_v47, %v2410_v55  ;;  %v1565_v37 = vsel %vm1563_vm6, %v1140_v47, %v2410_v55 }
 0x1db   : > { %2415 = vcosq.f32 %v1024_v20  ;;  %v2412_v30 = vpop.eup %2411  ;;  %vm1666_vm3 = vcmp.eq.s32.totalorder %v1661_v21, 2  ;;  %vm1035_vm4 = vcmp.eq.s32.totalorder %v1030_v18, 2  ;;  %vm1662_vm6 = vcmp.lt.s32.totalorder %v1661_v21, 2 }
 0x1dc   : > { %2417 = vsinq.f32 %v1024_v20  ;;  %v2414_v48 = vpop.eup %2413  ;;  %v1138_v62 = vsel %vm1136_vm2, %v2408_v7, %v1137_v42  ;;  %v1562_v59 = vsel %vm1560_vm5, %v2408_v7, %v1137_v42  ;;  %v1244_v6 = vxor.u32 2147483648, %v2412_v30 }
 0x1dd   : > { %v1241_v10 = vxor.u32 2147483648, %v2414_v48  ;;  %v1142_v61 = vsel %vm1135_vm12, %v1138_v62, %v1141_v9  ;;  %v1566_v4 = vsel %vm1559_vm13, %v1562_v59, %v1565_v37  ;;  %vm1032_vm2 = vcmp.eq.s32.totalorder %v1030_v18, 0 }
 0x1de   : > { %v1245_v24 = vsel %vm1243_vm9, %v1244_v6, %v2414_v48  ;;  %v1668_v1 = vsel %vm1666_vm3, %v1244_v6, %v2414_v48  ;;  %v1143_v2 = vsel %vm1132_vm7, nan, %v1142_v61  ;;  %v1567_v44 = vsel %vm1132_vm7, nan, %v1566_v4 }
 0x1df   : > { %v1242_v53 = vsel %vm1240_vm0, %v2412_v30, %v1241_v10  ;;  %v1665_v45 = vsel %vm1663_vm1, %v2412_v30, %v1241_v10  ;;  %vm1239_vm5 = vcmp.lt.s32.totalorder %v1238_v32, 2  ;;  %vm1031_vm12 = vcmp.lt.s32.totalorder %v1030_v18, 2 }
 0x1e0   : > { %v1246_v12 = vsel %vm1239_vm5, %v1242_v53, %v1245_v24  ;;  %v1669_v56 = vsel %vm1662_vm6, %v1665_v45, %v1668_v1  ;;  %vm1236_vm13 = vweird.f32 %v2671_v43  ;;  %v1257_v28 = vmul.f32 %v3000_v40, %v1143_v2  ;;  %v2435_v45 = vld [vmem:[%s2593_s18 + $0x10] sm:$0xff]  ;;  %v2436_v1 = vld [vmem:[%s2593_s18 + $0x18] sm:$0xff] }
 0x1e1   : > { %v1680_v35 = vmul.f32 %v3005_v63, %v1567_v44  ;;  %v1247_v27 = vsel %vm1236_vm13, nan, %v1246_v12  ;;  %v1670_v38 = vsel %vm1236_vm13, nan, %v1669_v56  ;;  %v2510_v49 = vmov 1   ;;  %v2165_v44 = vld [vmem:[%s3152_s5] ss:$0 sm:$0xff] }
 0x1e2   : > { %v1258_v41 = vmul.f32 %v3000_v40, %v1247_v27  ;;  %v1681_v23 = vmul.f32 %v3005_v63, %v1670_v38  ;;  %2400 = vset.pattern.permute.xlu1 %v2510_v49  ;;  %2399 = vset.pattern.permute.xlu0 %v2510_v49 }
 0x1e3   : > { %v1684_v25 = vadd.f32 %v1680_v35, %v1257_v28 }
 0x1e4   : > { %v1685_v60 = vadd.f32 %v1681_v23, %v1258_v41 }
 0x1e8   : > { %v2416_v11 = vpop.eup %2415 }
 0x1e9   : > { %v2418_v0 = vpop.eup %2417  ;;  %v1036_v50 = vxor.u32 2147483648, %v2416_v11 }
 0x1ea   : > { %v1033_v57 = vxor.u32 2147483648, %v2418_v0 }
 0x1eb   : > { %v1037_v58 = vsel %vm1035_vm4, %v1036_v50, %v2418_v0  ;;  %v1462_v8 = vsel %vm1460_vm15, %v1036_v50, %v2418_v0  ;;  %v2437_v0 = vld [vmem:[%s2593_s18 + $0x8] sm:$0xff]  ;;  %v2438_v50 = vld [vmem:[%s2593_s18] sm:$0xff] }
 0x1ec   : > { %v1034_v13 = vsel %vm1032_vm2, %v2416_v11, %v1033_v57  ;;  %v1459_v14 = vsel %vm1457_vm14, %v2416_v11, %v1033_v57 }
 0x1ed   : > { %v1038_v16 = vsel %vm1031_vm12, %v1034_v13, %v1037_v58  ;;  %v1463_v15 = vsel %vm1456_vm10, %v1459_v14, %v1462_v8 }
 0x1ee   : > { %v1039_v36 = vsel %vm1028_vm8, nan, %v1038_v16  ;;  %v1464_v17 = vsel %vm1028_vm8, nan, %v1463_v15 }
 0x1ef   : > { %v1256_v52 = vmul.f32 %v3000_v40, %v1039_v36  ;;  %v1679_v54 = vmul.f32 %v3005_v63, %v1464_v17 }
 0x1f1   : > { %v1683_v43 = vadd.f32 %v1679_v54, %v1256_v52 }
 0x1f3   : > { %2263 = vmatmul.mubr.msk.f32.vlgmr.msra.gmra.mxu1 %vm533_vm11, %v1683_v43 }
 0x1f4   : > { %2265 = vmatprep.mubr.msk.f32.mxu1 %vm533_vm11, %v1684_v25 }
 0x1f7   : > { %2266 = vmatmul.mubr.msk.f32.gmra.mxu1 %vm533_vm11, %v1685_v60 }
 0x231   : > { %v2360_v29 = vpop.permute.xlu1 %2359 }
 0x232   : > { %v2361_v39 = vunpack.i.l.bf16 %v2360_v29  ;;  %v2362_v32 = vunpack.i.h.bf16 %v2360_v29 }
 0x235   : > { %v2371_v19 = vpop.permute.xlu1 %2370 }
 0x236   : > { %v2372_v21 = vunpack.i.l.bf16 %v2371_v19  ;;  %v2373_v59 = vunpack.i.h.bf16 %v2371_v19 }
 0x238   : > { %v2366_v3 = vpop.permute.xlu0 %2365 }
 0x239   : > { %v2367_v46 = vunpack.i.l.bf16 %v2366_v3  ;;  %v2376_v20 = vpop.permute.xlu1 %2375  ;;  %v2368_v63 = vunpack.i.h.bf16 %v2366_v3 }
 0x23a   : > { %v2377_v40 = vunpack.i.l.bf16 %v2376_v20  ;;  %v2378_v42 = vunpack.i.h.bf16 %v2376_v20 }
 0x23c   : > { %v2381_v26 = vpop.permute.xlu0 %2380 }
 0x23d   : > { %v2382_v51 = vunpack.i.l.bf16 %v2381_v26  ;;  %v2386_v37 = vpop.permute.xlu1 %2385  ;;  %v2383_v61 = vunpack.i.h.bf16 %v2381_v26 }
 0x23e   : > { %v2387_v10 = vunpack.i.l.bf16 %v2386_v37  ;;  %v2388_v53 = vunpack.i.h.bf16 %v2386_v37 }
 0x241   : > { %v2396_v38 = vpop.permute.xlu1 %2395 }
 0x242   : > { %v2391_v36 = vpop.permute.xlu0 %2390 }
 0x275   : > { %v3067_v7 = vpop.f32.mrf.mxu1 }
 0x276   : > { %v663_v22 = vmul.f32 %v2367_v46, %v3067_v7  ;;  %v719_v5 = vmul.f32 %v2377_v40, %v3067_v7  ;;  %v775_v11 = vmul.f32 %v2387_v10, %v3067_v7  ;;  %v2392_v46 = vunpack.i.l.bf16 %v2391_v36 }
 0x277   : > { %v3070_v55 = vpop.f32.mrf.mxu1 }
 0x278   : > { %673 = vrot.lane.b32.xlu0 %v663_v22, %s2511_s21  ;;  %v661_v30 = vmul.f32 %v2361_v39, %v3070_v55  ;;  %v717_v9 = vmul.f32 %v2372_v21, %v3070_v55  ;;  %v773_v18 = vmul.f32 %v2382_v51, %v3070_v55  ;;  %v2393_v22 = vunpack.i.h.bf16 %v2391_v36 }
 0x279   : > { %v3072_v33 = vpop.f32.mrf.mxu1 }
 0x27a   : > { %v664_v34 = vmul.f32 %v2368_v63, %v3072_v33  ;;  %v720_v47 = vmul.f32 %v2378_v42, %v3072_v33  ;;  %v776_v24 = vmul.f32 %v2388_v53, %v3072_v33  ;;  %v2397_v63 = vunpack.i.l.bf16 %v2396_v38 }
 0x27b   : > { %v3078_v48 = vpop.f32.mrf.mxu1 }
 0x27c   : > { %675 = vrot.lane.b32.xlu1 %v664_v34, %s2511_s21  ;;  %729 = vrot.lane.b32.xlu0 %v719_v5, %s2512_s22  ;;  %v662_v62 = vmul.f32 %v2362_v32, %v3078_v48  ;;  %v718_v6 = vmul.f32 %v2373_v59, %v3078_v48  ;;  %v774_v4 = vmul.f32 %v2383_v61, %v3078_v48  ;;  %v2398_v32 = vunpack.i.h.bf16 %v2396_v38 }
 0x27d   : > { %v621_v34 = vmul.f32 %v2392_v46, %v3070_v55  ;;  %v622_v39 = vmul.f32 %v2393_v22, %v3078_v48  ;;  %v623_v21 = vmul.f32 %v2397_v63, %v3067_v7 }
 0x27e   : > { %v624_v59 = vmul.f32 %v2398_v32, %v3072_v33 }
 0x280   : > { %731 = vrot.lane.b32.xlu1 %v720_v47, %s2512_s22  ;;  %669 = vrot.lane.b32.xlu0 %v661_v30, %s2511_s21 }
 0x284   : > { %671 = vrot.lane.b32.xlu1 %v662_v62, %s2511_s21  ;;  %725 = vrot.lane.b32.xlu0 %v717_v9, %s2512_s22 }
 0x288   : > { %727 = vrot.lane.b32.xlu1 %v718_v6, %s2512_s22  ;;  %781 = vrot.lane.b32.xlu0 %v773_v18, %s2513_s23 }
 0x28c   : > { %783 = vrot.lane.b32.xlu1 %v774_v4, %s2513_s23  ;;  %785 = vrot.lane.b32.xlu0 %v775_v11, %s2513_s23 }
 0x290   : > { %787 = vrot.lane.b32.xlu1 %v776_v24, %s2513_s23  ;;  %1845 = vperm.xlu0 %2399, %v2435_v45  }
 0x294   : > { %1848 = vperm.xlu1 %2400, %v2436_v1   ;;  %1842 = vperm.xlu0 %2399, %v2437_v0  }
 0x298   : > { %1839 = vperm.xlu1 %2400, %v2438_v50  }
 0x2b3   : > { %v2264_v2 = vpop.f32.mrf.mxu1 }
 0x2b4   : > { %v1781_v8 = vadd.f32 %v2264_v2, %v2165_v44 }
 0x2b5   : > { %v1775_v57 = vpop.f32.mrf.mxu1 }
 0x2b6   : > { %v1776_v12 = vadd.f32 %v2165_v44, %v1775_v57  ;;  %v2171_v13 = vmul.f32 -1.442695, %v1781_v8 }
 0x2b7   : > { %v2267_v58 = vpop.f32.mrf.mxu1 }
 0x2b8   : > { %v1791_v14 = vadd.f32 %v2267_v58, %v2165_v44  ;;  %v2170_v16 = vmul.f32 -1.442695, %v1776_v12  ;;  %2419 = vpow2.f32 %v2171_v13 }
 0x2b9   : > { %v1785_v56 = vpop.f32.mrf.mxu1 }
 0x2ba   : > { %v1786_v15 = vadd.f32 %v2165_v44, %v1785_v56  ;;  %v2173_v28 = vmul.f32 -1.442695, %v1791_v14  ;;  %2421 = vpow2.f32 %v2170_v16 }
 0x2bc   : > { %v2172_v35 = vmul.f32 -1.442695, %v1786_v15  ;;  %2423 = vpow2.f32 %v2173_v28  ;;  %v2514_v28 = vmov 1.0|1.0  }
 0x2be   : > { %2425 = vpow2.f32 %v2172_v35 }
 0x2c5   : > { %v2420_v17 = vpop.eup %2419 }
 0x2c6   : > { %v1807_v52 = vadd.f32 1.0, %v2420_v17 }
 0x2c7   : > { %v2422_v27 = vpop.eup %2421 }
 0x2c8   : > { %v1806_v41 = vadd.f32 1.0, %v2422_v27  ;;  %2427 = vrcp.f32 %v1807_v52  ;;  %v1959_v52 = vld [vmem:[#allocation3 + $0x10] sm:$0xff] }
 0x2c9   : > { %v2424_v43 = vpop.eup %2423 }
 0x2ca   : > { %v1809_v25 = vadd.f32 1.0, %v2424_v43  ;;  %2429 = vrcp.f32 %v1806_v41  ;;  %v1957_v43 = vld [vmem:[#allocation3] sm:$0xff] }
 0x2cb   : > { %v2426_v23 = vpop.eup %2425 }
 0x2cc   : > { %v1808_v29 = vadd.f32 1.0, %v2426_v23  ;;  %2431 = vrcp.f32 %v1809_v25  ;;  %v1960_v23 = vld [vmem:[#allocation3 + $0x18] sm:$0xff] }
 0x2ce   : > { %2433 = vrcp.f32 %v1808_v29 }
 0x2d5   : > { %v2428_v30 = vpop.eup %2427 }
 0x2d6   : > { %v1819_v6 = vmul.f32 2.0, %v2428_v30 }
 0x2d7   : > { %v2430_v62 = vpop.eup %2429 }
 0x2d8   : > { %v1818_v11 = vmul.f32 2.0, %v2430_v62 }
 0x2d9   : > { %v2432_v61 = vpop.eup %2431 }
 0x2da   : > { %v1821_v57 = vmul.f32 2.0, %v2432_v61 }
 0x2db   : > { %v2434_v24 = vpop.eup %2433 }
 0x2dc   : > { %v1820_v2 = vmul.f32 2.0, %v2434_v24 }
 0x2ea   : > { %v674_v54 = vpop.permute.xlu0 %673 }
 0x2eb   : > { %v683_v9 = vadd.f32 %v674_v54, %v623_v21 }
 0x2ee   : > { %v676_v60 = vpop.permute.xlu1 %675  ;;  %v730_v49 = vpop.permute.xlu0 %729 }
 0x2ef   : > { %v684_v4 = vadd.f32 %v676_v60, %v624_v59  ;;  %v739_v48 = vadd.f32 %v730_v49, %v683_v9  ;;  %v1958_v49 = vld [vmem:[#allocation3 + $0x8] sm:$0xff] }
 0x2f2   : > { %v732_v19 = vpop.permute.xlu1 %731  ;;  %v670_v3 = vpop.permute.xlu0 %669 }
 0x2f3   : > { %v681_v5 = vadd.f32 %v670_v3, %v621_v34  ;;  %v740_v45 = vadd.f32 %v732_v19, %v684_v4  ;;  %v1963_v3 = vld [vmem:[#allocation3 + $0x30] sm:$0xff]  ;;  %v1964_v34 = vld [vmem:[#allocation3 + $0x38] sm:$0xff] }
 0x2f6   : > { %v672_v20 = vpop.permute.xlu1 %671  ;;  %v726_v40 = vpop.permute.xlu0 %725 }
 0x2f7   : > { %v682_v26 = vadd.f32 %v672_v20, %v622_v39  ;;  %v737_v51 = vadd.f32 %v726_v40, %v681_v5  ;;  %v1961_v40 = vld [vmem:[#allocation3 + $0x20] sm:$0xff] }
 0x2fa   : > { %v728_v42 = vpop.permute.xlu1 %727  ;;  %v782_v47 = vpop.permute.xlu0 %781 }
 0x2fb   : > { %v738_v37 = vadd.f32 %v728_v42, %v682_v26  ;;  %v793_v10 = vadd.f32 %v782_v47, %v737_v51  ;;  %v1962_v42 = vld [vmem:[#allocation3 + $0x28] sm:$0xff] }
 0x2fd   : > { %v1822_v1 = vmul.f32 %v1818_v11, %v793_v10 }
 0x2fe   : > { %v784_v18 = vpop.permute.xlu1 %783  ;;  %v786_v55 = vpop.permute.xlu0 %785 }
 0x2ff   : > { %v794_v53 = vadd.f32 %v784_v18, %v738_v37  ;;  %v795_v0 = vadd.f32 %v786_v55, %v739_v48 }
 0x301   : > { %v1823_v7 = vmul.f32 %v1819_v6, %v794_v53  ;;  %v1824_v58 = vmul.f32 %v1820_v2, %v795_v0 }
 0x302   : > { %v788_v50 = vpop.permute.xlu1 %787 }
 0x303   : > { %v796_v44 = vadd.f32 %v788_v50, %v740_v45  ;;  %v1826_v33 = vpack.c.bf16 %v1823_v7, %v1822_v1 }
 0x305   : > { %v1825_v8 = vmul.f32 %v1821_v57, %v796_v44  ;;  %v1830_v12 = vsel %vm533_vm11, %v1826_v33, 1065369472 }
 0x306   : > { %1864 = vxpose.xlu1.c.b16.start [1/2] (short) (narrow) %v1830_v12, 64 }
 0x307   : > { %v1827_v56 = vpack.c.bf16 %v1825_v8, %v1824_v58 }
 0x309   : > { %v1833_v13 = vsel %vm533_vm11, %v1827_v56, 1065369472 }
 0x30a   : > { %1865 = vxpose.xlu1.c.b16.end [2/2] (short) (narrow) %v1833_v13, 64 }
 0x30b   : > { %v1846_v14 = vpop.permute.xlu0 %1845 }
 0x30c   : > { %vm1852_vm7 = vcmp.eq.s32.totalorder %v1846_v14, %v2789_v31 }
 0x30f   : > { %v1849_v16 = vpop.permute.xlu1 %1848  ;;  %v1843_v15 = vpop.permute.xlu0 %1842 }
 0x310   : > { %vm1853_vm8 = vcmp.eq.s32.totalorder %v1849_v16, %v2789_v31  ;;  %vm1851_vm14 = vcmp.eq.s32.totalorder %v1843_v15, %v2789_v31 }
 0x311   : > { %vm2178_vm10 = vmpackc.low %vm1853_vm8, %vm1852_vm7 }
 0x312   : > { %2268 = vmatprep.subr.msk.bf16.mxu0 %vm2178_vm10, %v2514_v28 }
 0x313   : > { %v1840_v35 = vpop.permute.xlu1 %1839  ;;  %2269 = vmatpush3.bf16.msk.msra.mxu0 %vm2178_vm10, %v2514_v28 }
 0x314   : > { %vm1850_vm15 = vcmp.eq.s32.totalorder %v1840_v35, %v2789_v31 }
 0x315   : > { %vm2180_vm0 = vmpackc.low %vm1851_vm14, %vm1850_vm15 }
 0x316   : > { %2270 = vmatprep.subr.msk.bf16.mxu0 %vm2180_vm0, %v2514_v28 }
 0x317   : > { %2271 = vmatpush3.bf16.msk.msra.mxu0 %vm2180_vm0, %v2514_v28 }
 0x368   : > { %v1872_v36 = vpop.trf.xlu1 }
 0x369   : > { %2272 = vmatprep.mubr.msk.bf16.mxu0 %vm533_vm11, %v1872_v36 }
 0x36c   : > { %v1873_v17 = vpop.trf.xlu1 }
 0x36d   : > { %2273 = vmatmul.mubr.msk.bf16.vlgmr.msra.gmra.mxu0 %vm533_vm11, %v1873_v17 }
 0x370   : > { %v1874_v27 = vpop.trf.xlu1 }
 0x371   : > { %2276 = vmatprep.mubr.msk.bf16.mxu0 %vm533_vm11, %v1874_v27 }
 0x374   : > { %v1875_v38 = vpop.trf.xlu1 }
 0x375   : > { %2277 = vmatmul.mubr.msk.bf16.gmra.mxu0 %vm533_vm11, %v1875_v38 }
 0x42d   : > { %v2274_v54 = vpop.f32.mrf.mxu0 }
 0x42e   : > { %v1967_v41 = vadd.f32 %v2274_v54, %v1959_v52 }
 0x42f   : > { %v1926_v31 = vpop.f32.mrf.mxu0 }
 0x430   : > { %1975 = vst.msk [vmem:[#allocation3 + $0x10] sm:$0xff] %vm533_vm11, %v1967_v41  ;;  %v1965_v25 = vadd.f32 %v1957_v43, %v1926_v31 }
 0x431   : > { %v2275_v60 = vpop.f32.mrf.mxu0 }
 0x432   : > { %1973 = vst.msk [vmem:[#allocation3] sm:$0xff] %vm533_vm11, %v1965_v25  ;;  %v1968_v29 = vadd.f32 %v2275_v60, %v1960_v23 }
 0x433   : > { %v1929_v19 = vpop.f32.mrf.mxu0 }
 0x434   : > { %1976 = vst.msk [vmem:[#allocation3 + $0x18] sm:$0xff] %vm533_vm11, %v1968_v29  ;;  %v1966_v46 = vadd.f32 %v1958_v49, %v1929_v19 }
 0x435   : > { %v2278_v20 = vpop.f32.mrf.mxu0 }
 0x436   : > { %1974 = vst.msk [vmem:[#allocation3 + $0x8] sm:$0xff] %vm533_vm11, %v1966_v46  ;;  %v1971_v63 = vadd.f32 %v2278_v20, %v1963_v3 }
 0x437   : > { %v1942_v22 = vpop.f32.mrf.mxu0 }
 0x438   : > { %1979 = vst.msk [vmem:[#allocation3 + $0x30] sm:$0xff] %vm533_vm11, %v1971_v63  ;;  %v1969_v5 = vadd.f32 %v1961_v40, %v1942_v22 }
 0x439   : > { %v2279_v39 = vpop.f32.mrf.mxu0 }
 0x43a   : > { %1977 = vst.msk [vmem:[#allocation3 + $0x20] sm:$0xff] %vm533_vm11, %v1969_v5  ;;  %v1972_v47 = vadd.f32 %v2279_v39, %v1964_v34  ;;  %1984 = sbr.rel (%p2186_p6) target bundleno = 1123 (0x463), region = 64 }
 0x43b   : > { %v1945_v30 = vpop.f32.mrf.mxu0 }
 0x43c   : > { %1980 = vst.msk [vmem:[#allocation3 + $0x38] sm:$0xff] %vm533_vm11, %v1972_v47  ;;  %v1970_v32 = vadd.f32 %v1962_v42, %v1945_v30 }
 0x43e   : > { %1978 = vst.msk [vmem:[#allocation3 + $0x28] sm:$0xff] %vm533_vm11, %v1970_v32 }
 0x43f   : > { %v1991_v51 = vld [vmem:[#allocation3 + $0x30] sm:$0xff]  ;;  %v1985_v0 = vld [vmem:[#allocation3] sm:$0xff]  ;;  %v1986_v44 = vld [vmem:[#allocation3 + $0x8] sm:$0xff] }
 0x440   : > { %vm1995_vm3 = vcmp.eq.f32.partialorder %v1991_v51, 0.0  ;;  %v1987_v8 = vld [vmem:[#allocation3 + $0x10] sm:$0xff]  ;;  %v1988_v14 = vld [vmem:[#allocation3 + $0x18] sm:$0xff] }
 0x441   : > { %v1989_v21 = vld [vmem:[#allocation3 + $0x20] sm:$0xff]  ;;  %v1999_v10 = vsel %vm1995_vm3, 1.0, %v1991_v51 }
 0x442   : > { %vm1993_vm9 = vcmp.eq.f32.partialorder %v1989_v21, 0.0  ;;  %v2003_v18 = vadd.f32 1e-08, %v1999_v10 }
 0x443   : > { %v1997_v62 = vsel %vm1993_vm9, 1.0, %v1989_v21  ;;  %v1992_v9 = vld [vmem:[#allocation3 + $0x38] sm:$0xff] }
 0x444   : > { %v2001_v59 = vadd.f32 1e-08, %v1997_v62  ;;  %vm1996_vm2 = vcmp.eq.f32.partialorder %v1992_v9, 0.0 }
 0x445   : > { %v1990_v26 = vld [vmem:[#allocation3 + $0x28] sm:$0xff]  ;;  %v2000_v55 = vsel %vm1996_vm2, 1.0, %v1992_v9 }
 0x446   : > { %vm1994_vm1 = vcmp.eq.f32.partialorder %v1990_v26, 0.0  ;;  %2439 = vrcp.f32 %v2001_v59  ;;  %v2004_v61 = vadd.f32 1e-08, %v2000_v55 }
 0x447   : > { %v1998_v37 = vsel %vm1994_vm1, 1.0, %v1990_v26 }
 0x448   : > { %v2002_v6 = vadd.f32 1e-08, %v1998_v37 }
 0x44a   : > { %2441 = vrcp.f32 %v2002_v6 }
 0x44b   : > { %2443 = vrcp.f32 %v2003_v18 }
 0x44c   : > { %2445 = vrcp.f32 %v2004_v61 }
 0x453   : > { %v2440_v4 = vpop.eup %2439 }
 0x454   : > { %v2009_v11 = vmul.f32 %v2440_v4, %v2001_v59 }
 0x456   : > { %v2013_v1 = vsub.f32 2.0, %v2009_v11 }
 0x457   : > { %v2442_v48 = vpop.eup %2441 }
 0x458   : > { %v2444_v53 = vpop.eup %2443  ;;  %v2010_v24 = vmul.f32 %v2442_v48, %v2002_v6  ;;  %v2017_v57 = vmul.f32 %v2440_v4, %v2013_v1 }
 0x459   : > { %v2446_v45 = vpop.eup %2445  ;;  %v2011_v7 = vmul.f32 %v2444_v53, %v2003_v18 }
 0x45a   : > { %v2014_v50 = vsub.f32 2.0, %v2010_v24  ;;  %v2012_v2 = vmul.f32 %v2446_v45, %v2004_v61  ;;  %v2021_v56 = vmul.f32 %v2017_v57, %v1985_v0 }
 0x45b   : > { %v2015_v33 = vsub.f32 2.0, %v2011_v7 }
 0x45c   : > { %v2018_v58 = vmul.f32 %v2442_v48, %v2014_v50  ;;  %v2016_v12 = vsub.f32 2.0, %v2012_v2  ;;  %2025 = vst.msk [vmem:[#allocation4] sm:$0xff] %vm533_vm11, %v2021_v56 }
 0x45d   : > { %v2019_v13 = vmul.f32 %v2444_v53, %v2015_v33 }
 0x45e   : > { %v2022_v16 = vmul.f32 %v2018_v58, %v1986_v44  ;;  %v2020_v15 = vmul.f32 %v2446_v45, %v2016_v12 }
 0x45f   : > { %v2023_v28 = vmul.f32 %v2019_v13, %v1987_v8 }
 0x460   : > { %2026 = vst.msk [vmem:[#allocation4 + $0x8] sm:$0xff] %vm533_vm11, %v2022_v16  ;;  %v2024_v35 = vmul.f32 %v2020_v15, %v1988_v14 }
 0x461   : > { %2027 = vst.msk [vmem:[#allocation4 + $0x10] sm:$0xff] %vm533_vm11, %v2023_v28 }
 0x462   : > { %2028 = vst.msk [vmem:[#allocation4 + $0x18] sm:$0xff] %vm533_vm11, %v2024_v35 }
 0x463 PF: > { %p3123_p7 = scmp.eq.s32.totalorder %s2090_s12, 3  ;;  %s2515_s18 = smov [#allocation4]  }
 0x464   : > { %s2037_s26 = sshll.u32 %s2515_s18, 4  ;;  %s2038_s26 = int_to_ptr.vmem [resolvable:$true] %s2037_s26 }
 0x465   : > { %s2447_s27 = scalar_lea.vmem %s2038_s26, 512  ;;  %p2454_p11 = scmp.lt.s32.totalorder %s2038_s26, %s2038_s26 }
 0x466   : > { %p2448_p8 = scmp.ne.s32.totalorder %s2038_s26, %s2447_s27  ;;  %p2455_p12 = scmp.lt.s32.totalorder %s2447_s27, %s2447_s27 }
 0x468   : > { %p2449_p9 = pnand %p2448_p8, %p3123_p7  ;;  %p2456_p13 = por %p2455_p12, %p2454_p11 }
 0x46a   : > { %p2450_p10 = pneg %p2449_p9 }
 0x46c   : > { %p2457_p0 = pnand %p2456_p13, %p2450_p10 }
 0x46e   : > { %2460 = shalt.err (!%p2457_p0)
}
 0x46f   : > { %s2516_s28 = smov 128   ;;  %s2517_s12 = smov 8  }
 0x470   : > { %2305 = dma.vmem_to_hbm [thread:$0]  (%p3123_p7), %s2038_s26, 512, %s3156_s9, [#allocation5], %s2516_s28, %s2516_s28, %s2517_s12  }
 0x471   : > { %2484 = dma.done.wait (%p3123_p7), [#allocation5], 512  }
 0x472   : > { %2486 = vsyncadd (%p3123_p7), [#allocation5], 4294966784 }
 0x473 PF: > { %s20_s11 = sadd.s32 1, %s2497_s11   ;;  %s3164_s30 = smov %s2493_s10 }
 0x474   : > { %p17_p1 = scmp.ge.s32.totalorder %s20_s11, 6   ;;  %s3165_s10 = smov %s3167_s13 }
 0x476   :  { %19 = sbr.rel (!%p17_p1) target bundleno = 2 (0x2), region = 92 }
 0x47b   :  { %2053 = vsyncpa [#allocation5], 1 }
 0x47c   :  { %2055 = vsyncpa [#allocation5 + $0x1], 1 }

</bundles_post_ra>
